<compile_context>
chip_gen: v6e
topology: v6e:2x2x1
jax: 0.10.0
libtpu: 0.0.40
codegen_flags: <defaults>
</compile_context>

<pallas_src>
import functools

import jax
import jax.numpy as jnp
from jax.experimental import pallas as pl
from jax.experimental.pallas import tpu as pltpu

HIDDEN = 24          # ICNN hidden_num
LANES = 128          # vreg lane width
STRIP = 8            # rows per inner strip (one f32 vreg per live value)

# Packed SMEM parameter layout.
_OFF_W0 = 0 * HIDDEN
_OFF_B0 = 1 * HIDDEN
_OFF_WZ = 2 * HIDDEN
_OFF_CG = 3 * HIDDEN          # w0 * wz1     (for du)
_OFF_CH = 4 * HIDDEN          # w0^2 * wz1   (for d2u)
_IDX_WY1 = 5 * HIDDEN
_IDX_BY1 = 5 * HIDDEN + 1
_NPARAMS = 5 * HIDDEN + 2
_PARAM_PAD = 128              # pad packed params to 128 f32 (512 B in SMEM)


def _round_up(n, m):
    return (n + m - 1) // m * m


# ----------------------------------------------------------------------------
# Pallas kernel: per-element ICNN value / gradient / Hessian (closed form)
# ----------------------------------------------------------------------------
def _make_icnn_kernel(with_cost):
    def kernel(params_ref, x_ref, *out_refs):
        if with_cost:
            cost_ref, grad_ref, hess_ref = out_refs
        else:
            grad_ref, hess_ref = out_refs
            cost_ref = None

        n_strips = x_ref.shape[0] // STRIP
        wy1 = params_ref[_IDX_WY1]
        by1 = params_ref[_IDX_BY1]

        # Strip-mine the block: each iteration touches one (8,128) vreg-sized
        # row strip so the fully-unrolled 24-neuron loop keeps ~10 live vregs.
        @pl.loop(0, n_strips)
        def _(si):
            r0 = pl.multiple_of(si * STRIP, STRIP)
            x = x_ref[pl.ds(r0, STRIP), :]
            acc_u = jnp.zeros_like(x)
            acc_du = jnp.zeros_like(x)
            acc_d2u = jnp.zeros_like(x)

            # Statically-unrolled 24-neuron loop; per-neuron weights are scalar
            # SMEM reads broadcast over the (8,128) strip.
            for h in range(HIDDEN):
                w0h = params_ref[_OFF_W0 + h]
                b0h = params_ref[_OFF_B0 + h]
                wzh = params_ref[_OFF_WZ + h]
                cgh = params_ref[_OFF_CG + h]
                chh = params_ref[_OFF_CH + h]
                a = x * w0h + b0h
                t = jnp.exp(-jnp.abs(a))
                sp = jnp.maximum(a, 0.0) + jnp.log1p(t)    # softplus(a), stable
                s = jnp.exp(a - sp)                        # sigmoid(a) = e^(a - softplus(a))
                acc_u = acc_u + sp * wzh
                acc_du = acc_du + s * cgh
                acc_d2u = acc_d2u + (s - s * s) * chh      # sigmoid'(a) * ch

            u = acc_u + wy1 * x + by1
            tu = jnp.exp(-jnp.abs(u))
            spu = jnp.maximum(u, 0.0) + jnp.log1p(tu)      # softplus(u) == cost
            su = jnp.exp(u - spu)                          # sigmoid(u)
            du = acc_du + wy1
            g = su * du
            hess = (su - su * su) * (du * du) + su * acc_d2u

            if with_cost:
                cost_ref[pl.ds(r0, STRIP), :] = spu
            grad_ref[pl.ds(r0, STRIP), :] = g - hess * x   # approximate_cost2: grad - bmv(hess, tau)
            hess_ref[pl.ds(r0, STRIP), :] = hess

    return kernel


def pack_icnn_params(params):
    """Pack ICNN weights + precomputed per-neuron constants into one SMEM
    f32 vector (single tiny copy instead of per-step weight DMAs)."""
    w0, b0, wz1, wy1, by1 = params
    w0 = w0.reshape(-1).astype(jnp.float32)
    b0 = b0.reshape(-1).astype(jnp.float32)
    wz1 = wz1.reshape(-1).astype(jnp.float32)
    cg = w0 * wz1
    ch = w0 * w0 * wz1
    flat = jnp.concatenate([w0, b0, wz1, cg, ch,
                            wy1.reshape(-1).astype(jnp.float32),
                            by1.reshape(-1).astype(jnp.float32)])
    return jnp.pad(flat, (0, _PARAM_PAD - _NPARAMS))


@functools.partial(jax.jit, static_argnames=("block_rows", "with_cost"))
def icnn_eval_flat(x_flat, packed_params, block_rows=512, with_cost=True):
    """cost / grad / hess of the scalar ICNN for a flat f32 vector (lane-dense).

    Returns (cost, grad, hess) if with_cost else (grad, hess)."""
    N = x_flat.shape[0]
    rows = max(1, -(-N // LANES))
    rows8 = _round_up(rows, STRIP)
    if rows8 > STRIP:
        # At least two grid blocks so the "parallel" axis shards across the
        # two v7x TensorCores (no effect on single-TC v5e/v6e).
        br = min(block_rows, _round_up(-(-rows8 // 2), STRIP))
    else:
        br = rows8
    br = max(STRIP, _round_up(br, STRIP))
    rows_p = _round_up(rows8, br)
    Np = rows_p * LANES

    # TODO(synk): this pad/reshape still materializes the input once in HBM;
    # a fully fused path would require the producer to emit lane-dense
    # (rows, 128) data directly (minor: the kernel is compute-bound).
    xp = jnp.pad(x_flat.astype(jnp.float32), (0, Np - N)).reshape(rows_p, LANES)

    vec_spec = pl.BlockSpec((br, LANES), lambda i: (i, 0))
    out_shape = jax.ShapeDtypeStruct((rows_p, LANES), jnp.float32)
    n_out = 3 if with_cost else 2

    outs = pl.pallas_call(
        _make_icnn_kernel(with_cost),
        grid=(rows_p // br,),
        in_specs=[
            pl.BlockSpec(memory_space=pltpu.MemorySpace.SMEM),   # packed weights
            vec_spec,
        ],
        out_specs=[vec_spec] * n_out,
        out_shape=(out_shape,) * n_out,
        compiler_params=pltpu.CompilerParams(
            dimension_semantics=("parallel",)),                  # megacore-friendly
    )(packed_params, xp)

    return tuple(o.reshape(-1)[:N] for o in outs)


def icnn_approx_cost2(x_bt, params, block_rows=512):
    """JAX/Pallas equivalent of DRagent.approximate_cost2 for type='scalar'.

    x_bt: (B, T) batch-major scalar inputs.
    Returns (hessians (B, T), grads (B, T), costs (T, B, 1)) -- same
    conventions as the PyTorch method.
    """
    B, T = x_bt.shape
    cost, grad, hess = icnn_eval_flat(
        x_bt.reshape(-1), pack_icnn_params(params),
        block_rows=block_rows, with_cost=True)
    hessians = hess.reshape(B, T)                      # -> c2 / c4
    grads = grad.reshape(B, T)                         # -> c1 / c3
    costs = jnp.transpose(cost.reshape(B, T)).reshape(T, B, 1)
    return hessians, grads, costs


@jax.jit
def _forward_coeffs(trued, truep, packed_params):
    """Fused (c1, c2, c3, c4) for forward(): one pallas_call for d and p,
    cost output skipped (forward discards it)."""
    B, T = trued.shape
    N = B * T
    x = jnp.concatenate([trued.reshape(-1), truep.reshape(-1)])
    grad, hess = icnn_eval_flat(x, packed_params, with_cost=False)
    c2 = hess[:N].reshape(B, T)
    c1 = grad[:N].reshape(B, T)
    c4 = hess[N:].reshape(B, T)
    c3 = grad[N:].reshape(B, T)
    return c1, c2, c3, c4


# ----------------------------------------------------------------------------
# DRagent wrapper (type='scalar')
# ----------------------------------------------------------------------------
class DRagentPallas:
    def __init__(self, P1, P2, T, hidden=HIDDEN, key=jax.random.PRNGKey(0)):
        self.P1, self.P2, self.T = P1, P2, T
        self.E1 = jnp.ones((1,), jnp.float32) * 1.0
        self.E2 = jnp.ones((1,), jnp.float32) * 0.0
        self.eta1 = jnp.ones((1,), jnp.float32) * 0.95
        self.eta2 = jnp.ones((1,), jnp.float32) * 0.85

        # Deterministic ICNN parameter init (same shapes as the nn.Linear's).
        k0, k1, k2, k3, k4 = jax.random.split(key, 5)
        bnd_h = 1.0 / jnp.sqrt(jnp.float32(hidden))
        w0 = jax.random.uniform(k0, (1, hidden), jnp.float32, -1.0, 1.0)
        b0 = jax.random.uniform(k1, (1, hidden), jnp.float32, -1.0, 1.0)
        wz1 = jax.random.uniform(k2, (1, hidden), jnp.float32, -bnd_h, bnd_h)
        wy1 = jax.random.uniform(k3, (1, 1), jnp.float32, -1.0, 1.0)
        by1 = jax.random.uniform(k4, (1, 1), jnp.float32, -1.0, 1.0)
        self.icnn_params = (w0, b0, wz1, wy1, by1)
        self._packed_params = pack_icnn_params(self.icnn_params)

    def forward(self, price, e0, trued, truep):
        # type='scalar': d = trued.permute(1,0).unsqueeze(2); elementwise ICNN.
        c1, c2, c3, c4 = _forward_coeffs(trued, truep, self._packed_params)
        # TODO(synk): the cvxpy OptLayer (GUROBI QP with ineq1..ineq6) and the
        # 15-iteration fixed-point refinement of (d, p) have no Pallas
        # equivalent; we return the ICNN quadratic-cost coefficients
        # (c1, c2, c3, c4) that would be fed into that solver.
        return c1, c2, c3, c4


# ----------------------------------------------------------------------------
# Pure-JAX reference (autodiff of the scalar ICNN) for correctness checks
# ----------------------------------------------------------------------------
def _icnn_scalar(x, params):
    w0, b0, wz1, wy1, by1 = params
    a = x * w0[0] + b0[0]
    z1 = jax.nn.softplus(a)
    u = jnp.sum(z1 * wz1[0]) + wy1[0, 0] * x + by1[0, 0]
    return jax.nn.softplus(u)


if __name__ == "__main__":
    B, T = 2, 8
    key = jax.random.PRNGKey(0)
    kp, ke, kd, kq = jax.random.split(key, 4)

    price = jax.random.uniform(kp, (B, T), jnp.float32, 0.0, 1.0)
    e0 = jax.random.uniform(ke, (B, 1), jnp.float32, 0.0, 1.0)
    trued = jax.random.uniform(kd, (B, T), jnp.float32, 0.0, 1.0)
    truep = jax.random.uniform(kq, (B, T), jnp.float32, 0.0, 1.0)

    agent = DRagentPallas(P1=1.0, P2=1.0, T=T, key=jax.random.PRNGKey(42))

    c1, c2, c3, c4 = agent.forward(price, e0, trued, truep)
    jax.block_until_ready((c1, c2, c3, c4))

    # Verify kernel against jax.grad-based reference.
    gfun = jax.vmap(jax.grad(_icnn_scalar), in_axes=(0, None))
    hfun = jax.vmap(jax.grad(jax.grad(_icnn_scalar)), in_axes=(0, None))
    cfun = jax.vmap(_icnn_scalar, in_axes=(0, None))

    for x_bt, (c_h, c_g) in ((trued, (c2, c1)), (truep, (c4, c3))):
        xf = x_bt.reshape(-1)
        g_ref = gfun(xf, agent.icnn_params)
        h_ref = hfun(xf, agent.icnn_params)
        assert jnp.allclose(c_h, h_ref.reshape(B, T), atol=1e-4, rtol=1e-4)
        assert jnp.allclose(c_g, (g_ref - h_ref * xf).reshape(B, T),
                            atol=1e-4, rtol=1e-4)

    # Exercise multi-block (grid >= 2) paths: default block sizing (2 blocks
    # for the v7x megacore split) and a forced small block (grid = 3).
    B2, T2 = 4, 600
    x_big = jax.random.uniform(jax.random.PRNGKey(3), (B2, T2), jnp.float32,
                               -2.0, 2.0)
    xf = x_big.reshape(-1)
    g_ref = gfun(xf, agent.icnn_params)
    h_ref = hfun(xf, agent.icnn_params)
    c_ref = cfun(xf, agent.icnn_params)
    for brows in (512, 8):
        hss, grd, cst = icnn_approx_cost2(x_big, agent.icnn_params,
                                          block_rows=brows)
        jax.block_until_ready((hss, grd, cst))
        assert jnp.allclose(hss, h_ref.reshape(B2, T2), atol=1e-4, rtol=1e-4)
        assert jnp.allclose(grd, (g_ref - h_ref * xf).reshape(B2, T2),
                            atol=1e-4, rtol=1e-4)
        assert jnp.allclose(cst.reshape(-1),
                            jnp.transpose(c_ref.reshape(B2, T2)).reshape(-1),
                            atol=1e-4, rtol=1e-4)

    # A larger lane-dense case exercising several inner strips per block.
    B3, T3 = 8, 2048
    x_lg = jax.random.uniform(jax.random.PRNGKey(7), (B3, T3), jnp.float32,
                              -3.0, 3.0)
    hss, grd, cst = icnn_approx_cost2(x_lg, agent.icnn_params)
    jax.block_until_ready((hss, grd, cst))
    xf = x_lg.reshape(-1)
    g_ref = gfun(xf, agent.icnn_params)
    h_ref = hfun(xf, agent.icnn_params)
    assert jnp.allclose(hss, h_ref.reshape(B3, T3), atol=1e-4, rtol=1e-4)
    assert jnp.allclose(grd, (g_ref - h_ref * xf).reshape(B3, T3),
                        atol=1e-4, rtol=1e-4)

    print("KERNEL_OK")
</pallas_src>

<mosaic_0001>
module attributes {stable_mosaic.version = 11 : i64} {
  func.func @kernel(%arg0: i32, %arg1: memref<128xf32, #tpu.memory_space<smem>>, %arg2: memref<8x128xf32, #tpu.memory_space<vmem>>, %arg3: memref<8x128xf32, #tpu.memory_space<vmem>>, %arg4: memref<8x128xf32, #tpu.memory_space<vmem>>) attributes {dimension_semantics = [#tpu.dimension_semantics<parallel>], iteration_bounds = array<i64: 1>, scalar_prefetch = 0 : i64, scratch_operands = 0 : i64, tpu.core_type = #tpu.core_type<tc>, window_params = [{transform_indices = @transform_0, window_bounds = array<i64: 128>}, {transform_indices = @transform_1, window_bounds = array<i64: 8, 128>}, {transform_indices = @transform_2, window_bounds = array<i64: 8, 128>}, {transform_indices = @transform_3, window_bounds = array<i64: 8, 128>}]} {
    %c120 = arith.constant 120 : index
    %0 = memref.load %arg1[%c120] : memref<128xf32, #tpu.memory_space<smem>>
    %c121 = arith.constant 121 : index
    %1 = memref.load %arg1[%c121] : memref<128xf32, #tpu.memory_space<smem>>
    %c0_i32 = arith.constant 0 : i32
    %c1_i32 = arith.constant 1 : i32
    %2 = arith.muli %c0_i32, %c1_i32 : i32
    %c0_i32_0 = arith.constant 0 : i32
    %3 = arith.addi %c0_i32_0, %2 : i32
    %c8_i32 = arith.constant 8 : i32
    %4 = arith.muli %3, %c8_i32 : i32
    %5 = tpu.assume_multiple %4, 8 : i32
    %6 = arith.index_cast %5 : i32 to index
    %c0 = arith.constant 0 : index
    %7 = vector.load %arg2[%6, %c0] : memref<8x128xf32, #tpu.memory_space<vmem>>, vector<8x128xf32>
    %cst = arith.constant 0.000000e+00 : f32
    %8 = vector.broadcast %cst : f32 to vector<8x128xf32>
    %cst_1 = arith.constant 0.000000e+00 : f32
    %9 = vector.broadcast %cst_1 : f32 to vector<8x128xf32>
    %cst_2 = arith.constant 0.000000e+00 : f32
    %10 = vector.broadcast %cst_2 : f32 to vector<8x128xf32>
    %c0_3 = arith.constant 0 : index
    %11 = memref.load %arg1[%c0_3] : memref<128xf32, #tpu.memory_space<smem>>
    %c24 = arith.constant 24 : index
    %12 = memref.load %arg1[%c24] : memref<128xf32, #tpu.memory_space<smem>>
    %c48 = arith.constant 48 : index
    %13 = memref.load %arg1[%c48] : memref<128xf32, #tpu.memory_space<smem>>
    %c72 = arith.constant 72 : index
    %14 = memref.load %arg1[%c72] : memref<128xf32, #tpu.memory_space<smem>>
    %c96 = arith.constant 96 : index
    %15 = memref.load %arg1[%c96] : memref<128xf32, #tpu.memory_space<smem>>
    %16 = vector.broadcast %11 : f32 to vector<8x128xf32>
    %17 = arith.mulf %7, %16 : vector<8x128xf32>
    %18 = vector.broadcast %12 : f32 to vector<8x128xf32>
    %19 = arith.addf %17, %18 : vector<8x128xf32>
    %20 = math.absf %19 : vector<8x128xf32>
    %cst_4 = arith.constant 0.000000e+00 : f32
    %21 = vector.broadcast %cst_4 : f32 to vector<8x128xf32>
    %22 = arith.subf %21, %20 : vector<8x128xf32>
    %23 = math.exp %22 : vector<8x128xf32>
    %cst_5 = arith.constant 0.000000e+00 : f32
    %24 = vector.broadcast %cst_5 : f32 to vector<8x128xf32>
    %25 = arith.maximumf %19, %24 : vector<8x128xf32>
    %26 = math.log1p %23 : vector<8x128xf32>
    %27 = arith.addf %25, %26 : vector<8x128xf32>
    %28 = arith.subf %19, %27 : vector<8x128xf32>
    %29 = math.exp %28 : vector<8x128xf32>
    %30 = vector.broadcast %13 : f32 to vector<8x128xf32>
    %31 = arith.mulf %27, %30 : vector<8x128xf32>
    %32 = arith.addf %8, %31 : vector<8x128xf32>
    %33 = vector.broadcast %14 : f32 to vector<8x128xf32>
    %34 = arith.mulf %29, %33 : vector<8x128xf32>
    %35 = arith.addf %9, %34 : vector<8x128xf32>
    %36 = arith.mulf %29, %29 : vector<8x128xf32>
    %37 = arith.subf %29, %36 : vector<8x128xf32>
    %38 = vector.broadcast %15 : f32 to vector<8x128xf32>
    %39 = arith.mulf %37, %38 : vector<8x128xf32>
    %40 = arith.addf %10, %39 : vector<8x128xf32>
    %c1 = arith.constant 1 : index
    %41 = memref.load %arg1[%c1] : memref<128xf32, #tpu.memory_space<smem>>
    %c25 = arith.constant 25 : index
    %42 = memref.load %arg1[%c25] : memref<128xf32, #tpu.memory_space<smem>>
    %c49 = arith.constant 49 : index
    %43 = memref.load %arg1[%c49] : memref<128xf32, #tpu.memory_space<smem>>
    %c73 = arith.constant 73 : index
    %44 = memref.load %arg1[%c73] : memref<128xf32, #tpu.memory_space<smem>>
    %c97 = arith.constant 97 : index
    %45 = memref.load %arg1[%c97] : memref<128xf32, #tpu.memory_space<smem>>
    %46 = vector.broadcast %41 : f32 to vector<8x128xf32>
    %47 = arith.mulf %7, %46 : vector<8x128xf32>
    %48 = vector.broadcast %42 : f32 to vector<8x128xf32>
    %49 = arith.addf %47, %48 : vector<8x128xf32>
    %50 = math.absf %49 : vector<8x128xf32>
    %cst_6 = arith.constant 0.000000e+00 : f32
    %51 = vector.broadcast %cst_6 : f32 to vector<8x128xf32>
    %52 = arith.subf %51, %50 : vector<8x128xf32>
    %53 = math.exp %52 : vector<8x128xf32>
    %cst_7 = arith.constant 0.000000e+00 : f32
    %54 = vector.broadcast %cst_7 : f32 to vector<8x128xf32>
    %55 = arith.maximumf %49, %54 : vector<8x128xf32>
    %56 = math.log1p %53 : vector<8x128xf32>
    %57 = arith.addf %55, %56 : vector<8x128xf32>
    %58 = arith.subf %49, %57 : vector<8x128xf32>
    %59 = math.exp %58 : vector<8x128xf32>
    %60 = vector.broadcast %43 : f32 to vector<8x128xf32>
    %61 = arith.mulf %57, %60 : vector<8x128xf32>
    %62 = arith.addf %32, %61 : vector<8x128xf32>
    %63 = vector.broadcast %44 : f32 to vector<8x128xf32>
    %64 = arith.mulf %59, %63 : vector<8x128xf32>
    %65 = arith.addf %35, %64 : vector<8x128xf32>
    %66 = arith.mulf %59, %59 : vector<8x128xf32>
    %67 = arith.subf %59, %66 : vector<8x128xf32>
    %68 = vector.broadcast %45 : f32 to vector<8x128xf32>
    %69 = arith.mulf %67, %68 : vector<8x128xf32>
    %70 = arith.addf %40, %69 : vector<8x128xf32>
    %c2 = arith.constant 2 : index
    %71 = memref.load %arg1[%c2] : memref<128xf32, #tpu.memory_space<smem>>
    %c26 = arith.constant 26 : index
    %72 = memref.load %arg1[%c26] : memref<128xf32, #tpu.memory_space<smem>>
    %c50 = arith.constant 50 : index
    %73 = memref.load %arg1[%c50] : memref<128xf32, #tpu.memory_space<smem>>
    %c74 = arith.constant 74 : index
    %74 = memref.load %arg1[%c74] : memref<128xf32, #tpu.memory_space<smem>>
    %c98 = arith.constant 98 : index
    %75 = memref.load %arg1[%c98] : memref<128xf32, #tpu.memory_space<smem>>
    %76 = vector.broadcast %71 : f32 to vector<8x128xf32>
    %77 = arith.mulf %7, %76 : vector<8x128xf32>
    %78 = vector.broadcast %72 : f32 to vector<8x128xf32>
    %79 = arith.addf %77, %78 : vector<8x128xf32>
    %80 = math.absf %79 : vector<8x128xf32>
    %cst_8 = arith.constant 0.000000e+00 : f32
    %81 = vector.broadcast %cst_8 : f32 to vector<8x128xf32>
    %82 = arith.subf %81, %80 : vector<8x128xf32>
    %83 = math.exp %82 : vector<8x128xf32>
    %cst_9 = arith.constant 0.000000e+00 : f32
    %84 = vector.broadcast %cst_9 : f32 to vector<8x128xf32>
    %85 = arith.maximumf %79, %84 : vector<8x128xf32>
    %86 = math.log1p %83 : vector<8x128xf32>
    %87 = arith.addf %85, %86 : vector<8x128xf32>
    %88 = arith.subf %79, %87 : vector<8x128xf32>
    %89 = math.exp %88 : vector<8x128xf32>
    %90 = vector.broadcast %73 : f32 to vector<8x128xf32>
    %91 = arith.mulf %87, %90 : vector<8x128xf32>
    %92 = arith.addf %62, %91 : vector<8x128xf32>
    %93 = vector.broadcast %74 : f32 to vector<8x128xf32>
    %94 = arith.mulf %89, %93 : vector<8x128xf32>
    %95 = arith.addf %65, %94 : vector<8x128xf32>
    %96 = arith.mulf %89, %89 : vector<8x128xf32>
    %97 = arith.subf %89, %96 : vector<8x128xf32>
    %98 = vector.broadcast %75 : f32 to vector<8x128xf32>
    %99 = arith.mulf %97, %98 : vector<8x128xf32>
    %100 = arith.addf %70, %99 : vector<8x128xf32>
    %c3 = arith.constant 3 : index
    %101 = memref.load %arg1[%c3] : memref<128xf32, #tpu.memory_space<smem>>
    %c27 = arith.constant 27 : index
    %102 = memref.load %arg1[%c27] : memref<128xf32, #tpu.memory_space<smem>>
    %c51 = arith.constant 51 : index
    %103 = memref.load %arg1[%c51] : memref<128xf32, #tpu.memory_space<smem>>
    %c75 = arith.constant 75 : index
    %104 = memref.load %arg1[%c75] : memref<128xf32, #tpu.memory_space<smem>>
    %c99 = arith.constant 99 : index
    %105 = memref.load %arg1[%c99] : memref<128xf32, #tpu.memory_space<smem>>
    %106 = vector.broadcast %101 : f32 to vector<8x128xf32>
    %107 = arith.mulf %7, %106 : vector<8x128xf32>
    %108 = vector.broadcast %102 : f32 to vector<8x128xf32>
    %109 = arith.addf %107, %108 : vector<8x128xf32>
    %110 = math.absf %109 : vector<8x128xf32>
    %cst_10 = arith.constant 0.000000e+00 : f32
    %111 = vector.broadcast %cst_10 : f32 to vector<8x128xf32>
    %112 = arith.subf %111, %110 : vector<8x128xf32>
    %113 = math.exp %112 : vector<8x128xf32>
    %cst_11 = arith.constant 0.000000e+00 : f32
    %114 = vector.broadcast %cst_11 : f32 to vector<8x128xf32>
    %115 = arith.maximumf %109, %114 : vector<8x128xf32>
    %116 = math.log1p %113 : vector<8x128xf32>
    %117 = arith.addf %115, %116 : vector<8x128xf32>
    %118 = arith.subf %109, %117 : vector<8x128xf32>
    %119 = math.exp %118 : vector<8x128xf32>
    %120 = vector.broadcast %103 : f32 to vector<8x128xf32>
    %121 = arith.mulf %117, %120 : vector<8x128xf32>
    %122 = arith.addf %92, %121 : vector<8x128xf32>
    %123 = vector.broadcast %104 : f32 to vector<8x128xf32>
    %124 = arith.mulf %119, %123 : vector<8x128xf32>
    %125 = arith.addf %95, %124 : vector<8x128xf32>
    %126 = arith.mulf %119, %119 : vector<8x128xf32>
    %127 = arith.subf %119, %126 : vector<8x128xf32>
    %128 = vector.broadcast %105 : f32 to vector<8x128xf32>
    %129 = arith.mulf %127, %128 : vector<8x128xf32>
    %130 = arith.addf %100, %129 : vector<8x128xf32>
    %c4 = arith.constant 4 : index
    %131 = memref.load %arg1[%c4] : memref<128xf32, #tpu.memory_space<smem>>
    %c28 = arith.constant 28 : index
    %132 = memref.load %arg1[%c28] : memref<128xf32, #tpu.memory_space<smem>>
    %c52 = arith.constant 52 : index
    %133 = memref.load %arg1[%c52] : memref<128xf32, #tpu.memory_space<smem>>
    %c76 = arith.constant 76 : index
    %134 = memref.load %arg1[%c76] : memref<128xf32, #tpu.memory_space<smem>>
    %c100 = arith.constant 100 : index
    %135 = memref.load %arg1[%c100] : memref<128xf32, #tpu.memory_space<smem>>
    %136 = vector.broadcast %131 : f32 to vector<8x128xf32>
    %137 = arith.mulf %7, %136 : vector<8x128xf32>
    %138 = vector.broadcast %132 : f32 to vector<8x128xf32>
    %139 = arith.addf %137, %138 : vector<8x128xf32>
    %140 = math.absf %139 : vector<8x128xf32>
    %cst_12 = arith.constant 0.000000e+00 : f32
    %141 = vector.broadcast %cst_12 : f32 to vector<8x128xf32>
    %142 = arith.subf %141, %140 : vector<8x128xf32>
    %143 = math.exp %142 : vector<8x128xf32>
    %cst_13 = arith.constant 0.000000e+00 : f32
    %144 = vector.broadcast %cst_13 : f32 to vector<8x128xf32>
    %145 = arith.maximumf %139, %144 : vector<8x128xf32>
    %146 = math.log1p %143 : vector<8x128xf32>
    %147 = arith.addf %145, %146 : vector<8x128xf32>
    %148 = arith.subf %139, %147 : vector<8x128xf32>
    %149 = math.exp %148 : vector<8x128xf32>
    %150 = vector.broadcast %133 : f32 to vector<8x128xf32>
    %151 = arith.mulf %147, %150 : vector<8x128xf32>
    %152 = arith.addf %122, %151 : vector<8x128xf32>
    %153 = vector.broadcast %134 : f32 to vector<8x128xf32>
    %154 = arith.mulf %149, %153 : vector<8x128xf32>
    %155 = arith.addf %125, %154 : vector<8x128xf32>
    %156 = arith.mulf %149, %149 : vector<8x128xf32>
    %157 = arith.subf %149, %156 : vector<8x128xf32>
    %158 = vector.broadcast %135 : f32 to vector<8x128xf32>
    %159 = arith.mulf %157, %158 : vector<8x128xf32>
    %160 = arith.addf %130, %159 : vector<8x128xf32>
    %c5 = arith.constant 5 : index
    %161 = memref.load %arg1[%c5] : memref<128xf32, #tpu.memory_space<smem>>
    %c29 = arith.constant 29 : index
    %162 = memref.load %arg1[%c29] : memref<128xf32, #tpu.memory_space<smem>>
    %c53 = arith.constant 53 : index
    %163 = memref.load %arg1[%c53] : memref<128xf32, #tpu.memory_space<smem>>
    %c77 = arith.constant 77 : index
    %164 = memref.load %arg1[%c77] : memref<128xf32, #tpu.memory_space<smem>>
    %c101 = arith.constant 101 : index
    %165 = memref.load %arg1[%c101] : memref<128xf32, #tpu.memory_space<smem>>
    %166 = vector.broadcast %161 : f32 to vector<8x128xf32>
    %167 = arith.mulf %7, %166 : vector<8x128xf32>
    %168 = vector.broadcast %162 : f32 to vector<8x128xf32>
    %169 = arith.addf %167, %168 : vector<8x128xf32>
    %170 = math.absf %169 : vector<8x128xf32>
    %cst_14 = arith.constant 0.000000e+00 : f32
    %171 = vector.broadcast %cst_14 : f32 to vector<8x128xf32>
    %172 = arith.subf %171, %170 : vector<8x128xf32>
    %173 = math.exp %172 : vector<8x128xf32>
    %cst_15 = arith.constant 0.000000e+00 : f32
    %174 = vector.broadcast %cst_15 : f32 to vector<8x128xf32>
    %175 = arith.maximumf %169, %174 : vector<8x128xf32>
    %176 = math.log1p %173 : vector<8x128xf32>
    %177 = arith.addf %175, %176 : vector<8x128xf32>
    %178 = arith.subf %169, %177 : vector<8x128xf32>
    %179 = math.exp %178 : vector<8x128xf32>
    %180 = vector.broadcast %163 : f32 to vector<8x128xf32>
    %181 = arith.mulf %177, %180 : vector<8x128xf32>
    %182 = arith.addf %152, %181 : vector<8x128xf32>
    %183 = vector.broadcast %164 : f32 to vector<8x128xf32>
    %184 = arith.mulf %179, %183 : vector<8x128xf32>
    %185 = arith.addf %155, %184 : vector<8x128xf32>
    %186 = arith.mulf %179, %179 : vector<8x128xf32>
    %187 = arith.subf %179, %186 : vector<8x128xf32>
    %188 = vector.broadcast %165 : f32 to vector<8x128xf32>
    %189 = arith.mulf %187, %188 : vector<8x128xf32>
    %190 = arith.addf %160, %189 : vector<8x128xf32>
    %c6 = arith.constant 6 : index
    %191 = memref.load %arg1[%c6] : memref<128xf32, #tpu.memory_space<smem>>
    %c30 = arith.constant 30 : index
    %192 = memref.load %arg1[%c30] : memref<128xf32, #tpu.memory_space<smem>>
    %c54 = arith.constant 54 : index
    %193 = memref.load %arg1[%c54] : memref<128xf32, #tpu.memory_space<smem>>
    %c78 = arith.constant 78 : index
    %194 = memref.load %arg1[%c78] : memref<128xf32, #tpu.memory_space<smem>>
    %c102 = arith.constant 102 : index
    %195 = memref.load %arg1[%c102] : memref<128xf32, #tpu.memory_space<smem>>
    %196 = vector.broadcast %191 : f32 to vector<8x128xf32>
    %197 = arith.mulf %7, %196 : vector<8x128xf32>
    %198 = vector.broadcast %192 : f32 to vector<8x128xf32>
    %199 = arith.addf %197, %198 : vector<8x128xf32>
    %200 = math.absf %199 : vector<8x128xf32>
    %cst_16 = arith.constant 0.000000e+00 : f32
    %201 = vector.broadcast %cst_16 : f32 to vector<8x128xf32>
    %202 = arith.subf %201, %200 : vector<8x128xf32>
    %203 = math.exp %202 : vector<8x128xf32>
    %cst_17 = arith.constant 0.000000e+00 : f32
    %204 = vector.broadcast %cst_17 : f32 to vector<8x128xf32>
    %205 = arith.maximumf %199, %204 : vector<8x128xf32>
    %206 = math.log1p %203 : vector<8x128xf32>
    %207 = arith.addf %205, %206 : vector<8x128xf32>
    %208 = arith.subf %199, %207 : vector<8x128xf32>
    %209 = math.exp %208 : vector<8x128xf32>
    %210 = vector.broadcast %193 : f32 to vector<8x128xf32>
    %211 = arith.mulf %207, %210 : vector<8x128xf32>
    %212 = arith.addf %182, %211 : vector<8x128xf32>
    %213 = vector.broadcast %194 : f32 to vector<8x128xf32>
    %214 = arith.mulf %209, %213 : vector<8x128xf32>
    %215 = arith.addf %185, %214 : vector<8x128xf32>
    %216 = arith.mulf %209, %209 : vector<8x128xf32>
    %217 = arith.subf %209, %216 : vector<8x128xf32>
    %218 = vector.broadcast %195 : f32 to vector<8x128xf32>
    %219 = arith.mulf %217, %218 : vector<8x128xf32>
    %220 = arith.addf %190, %219 : vector<8x128xf32>
    %c7 = arith.constant 7 : index
    %221 = memref.load %arg1[%c7] : memref<128xf32, #tpu.memory_space<smem>>
    %c31 = arith.constant 31 : index
    %222 = memref.load %arg1[%c31] : memref<128xf32, #tpu.memory_space<smem>>
    %c55 = arith.constant 55 : index
    %223 = memref.load %arg1[%c55] : memref<128xf32, #tpu.memory_space<smem>>
    %c79 = arith.constant 79 : index
    %224 = memref.load %arg1[%c79] : memref<128xf32, #tpu.memory_space<smem>>
    %c103 = arith.constant 103 : index
    %225 = memref.load %arg1[%c103] : memref<128xf32, #tpu.memory_space<smem>>
    %226 = vector.broadcast %221 : f32 to vector<8x128xf32>
    %227 = arith.mulf %7, %226 : vector<8x128xf32>
    %228 = vector.broadcast %222 : f32 to vector<8x128xf32>
    %229 = arith.addf %227, %228 : vector<8x128xf32>
    %230 = math.absf %229 : vector<8x128xf32>
    %cst_18 = arith.constant 0.000000e+00 : f32
    %231 = vector.broadcast %cst_18 : f32 to vector<8x128xf32>
    %232 = arith.subf %231, %230 : vector<8x128xf32>
    %233 = math.exp %232 : vector<8x128xf32>
    %cst_19 = arith.constant 0.000000e+00 : f32
    %234 = vector.broadcast %cst_19 : f32 to vector<8x128xf32>
    %235 = arith.maximumf %229, %234 : vector<8x128xf32>
    %236 = math.log1p %233 : vector<8x128xf32>
    %237 = arith.addf %235, %236 : vector<8x128xf32>
    %238 = arith.subf %229, %237 : vector<8x128xf32>
    %239 = math.exp %238 : vector<8x128xf32>
    %240 = vector.broadcast %223 : f32 to vector<8x128xf32>
    %241 = arith.mulf %237, %240 : vector<8x128xf32>
    %242 = arith.addf %212, %241 : vector<8x128xf32>
    %243 = vector.broadcast %224 : f32 to vector<8x128xf32>
    %244 = arith.mulf %239, %243 : vector<8x128xf32>
    %245 = arith.addf %215, %244 : vector<8x128xf32>
    %246 = arith.mulf %239, %239 : vector<8x128xf32>
    %247 = arith.subf %239, %246 : vector<8x128xf32>
    %248 = vector.broadcast %225 : f32 to vector<8x128xf32>
    %249 = arith.mulf %247, %248 : vector<8x128xf32>
    %250 = arith.addf %220, %249 : vector<8x128xf32>
    %c8 = arith.constant 8 : index
    %251 = memref.load %arg1[%c8] : memref<128xf32, #tpu.memory_space<smem>>
    %c32 = arith.constant 32 : index
    %252 = memref.load %arg1[%c32] : memref<128xf32, #tpu.memory_space<smem>>
    %c56 = arith.constant 56 : index
    %253 = memref.load %arg1[%c56] : memref<128xf32, #tpu.memory_space<smem>>
    %c80 = arith.constant 80 : index
    %254 = memref.load %arg1[%c80] : memref<128xf32, #tpu.memory_space<smem>>
    %c104 = arith.constant 104 : index
    %255 = memref.load %arg1[%c104] : memref<128xf32, #tpu.memory_space<smem>>
    %256 = vector.broadcast %251 : f32 to vector<8x128xf32>
    %257 = arith.mulf %7, %256 : vector<8x128xf32>
    %258 = vector.broadcast %252 : f32 to vector<8x128xf32>
    %259 = arith.addf %257, %258 : vector<8x128xf32>
    %260 = math.absf %259 : vector<8x128xf32>
    %cst_20 = arith.constant 0.000000e+00 : f32
    %261 = vector.broadcast %cst_20 : f32 to vector<8x128xf32>
    %262 = arith.subf %261, %260 : vector<8x128xf32>
    %263 = math.exp %262 : vector<8x128xf32>
    %cst_21 = arith.constant 0.000000e+00 : f32
    %264 = vector.broadcast %cst_21 : f32 to vector<8x128xf32>
    %265 = arith.maximumf %259, %264 : vector<8x128xf32>
    %266 = math.log1p %263 : vector<8x128xf32>
    %267 = arith.addf %265, %266 : vector<8x128xf32>
    %268 = arith.subf %259, %267 : vector<8x128xf32>
    %269 = math.exp %268 : vector<8x128xf32>
    %270 = vector.broadcast %253 : f32 to vector<8x128xf32>
    %271 = arith.mulf %267, %270 : vector<8x128xf32>
    %272 = arith.addf %242, %271 : vector<8x128xf32>
    %273 = vector.broadcast %254 : f32 to vector<8x128xf32>
    %274 = arith.mulf %269, %273 : vector<8x128xf32>
    %275 = arith.addf %245, %274 : vector<8x128xf32>
    %276 = arith.mulf %269, %269 : vector<8x128xf32>
    %277 = arith.subf %269, %276 : vector<8x128xf32>
    %278 = vector.broadcast %255 : f32 to vector<8x128xf32>
    %279 = arith.mulf %277, %278 : vector<8x128xf32>
    %280 = arith.addf %250, %279 : vector<8x128xf32>
    %c9 = arith.constant 9 : index
    %281 = memref.load %arg1[%c9] : memref<128xf32, #tpu.memory_space<smem>>
    %c33 = arith.constant 33 : index
    %282 = memref.load %arg1[%c33] : memref<128xf32, #tpu.memory_space<smem>>
    %c57 = arith.constant 57 : index
    %283 = memref.load %arg1[%c57] : memref<128xf32, #tpu.memory_space<smem>>
    %c81 = arith.constant 81 : index
    %284 = memref.load %arg1[%c81] : memref<128xf32, #tpu.memory_space<smem>>
    %c105 = arith.constant 105 : index
    %285 = memref.load %arg1[%c105] : memref<128xf32, #tpu.memory_space<smem>>
    %286 = vector.broadcast %281 : f32 to vector<8x128xf32>
    %287 = arith.mulf %7, %286 : vector<8x128xf32>
    %288 = vector.broadcast %282 : f32 to vector<8x128xf32>
    %289 = arith.addf %287, %288 : vector<8x128xf32>
    %290 = math.absf %289 : vector<8x128xf32>
    %cst_22 = arith.constant 0.000000e+00 : f32
    %291 = vector.broadcast %cst_22 : f32 to vector<8x128xf32>
    %292 = arith.subf %291, %290 : vector<8x128xf32>
    %293 = math.exp %292 : vector<8x128xf32>
    %cst_23 = arith.constant 0.000000e+00 : f32
    %294 = vector.broadcast %cst_23 : f32 to vector<8x128xf32>
    %295 = arith.maximumf %289, %294 : vector<8x128xf32>
    %296 = math.log1p %293 : vector<8x128xf32>
    %297 = arith.addf %295, %296 : vector<8x128xf32>
    %298 = arith.subf %289, %297 : vector<8x128xf32>
    %299 = math.exp %298 : vector<8x128xf32>
    %300 = vector.broadcast %283 : f32 to vector<8x128xf32>
    %301 = arith.mulf %297, %300 : vector<8x128xf32>
    %302 = arith.addf %272, %301 : vector<8x128xf32>
    %303 = vector.broadcast %284 : f32 to vector<8x128xf32>
    %304 = arith.mulf %299, %303 : vector<8x128xf32>
    %305 = arith.addf %275, %304 : vector<8x128xf32>
    %306 = arith.mulf %299, %299 : vector<8x128xf32>
    %307 = arith.subf %299, %306 : vector<8x128xf32>
    %308 = vector.broadcast %285 : f32 to vector<8x128xf32>
    %309 = arith.mulf %307, %308 : vector<8x128xf32>
    %310 = arith.addf %280, %309 : vector<8x128xf32>
    %c10 = arith.constant 10 : index
    %311 = memref.load %arg1[%c10] : memref<128xf32, #tpu.memory_space<smem>>
    %c34 = arith.constant 34 : index
    %312 = memref.load %arg1[%c34] : memref<128xf32, #tpu.memory_space<smem>>
    %c58 = arith.constant 58 : index
    %313 = memref.load %arg1[%c58] : memref<128xf32, #tpu.memory_space<smem>>
    %c82 = arith.constant 82 : index
    %314 = memref.load %arg1[%c82] : memref<128xf32, #tpu.memory_space<smem>>
    %c106 = arith.constant 106 : index
    %315 = memref.load %arg1[%c106] : memref<128xf32, #tpu.memory_space<smem>>
    %316 = vector.broadcast %311 : f32 to vector<8x128xf32>
    %317 = arith.mulf %7, %316 : vector<8x128xf32>
    %318 = vector.broadcast %312 : f32 to vector<8x128xf32>
    %319 = arith.addf %317, %318 : vector<8x128xf32>
    %320 = math.absf %319 : vector<8x128xf32>
    %cst_24 = arith.constant 0.000000e+00 : f32
    %321 = vector.broadcast %cst_24 : f32 to vector<8x128xf32>
    %322 = arith.subf %321, %320 : vector<8x128xf32>
    %323 = math.exp %322 : vector<8x128xf32>
    %cst_25 = arith.constant 0.000000e+00 : f32
    %324 = vector.broadcast %cst_25 : f32 to vector<8x128xf32>
    %325 = arith.maximumf %319, %324 : vector<8x128xf32>
    %326 = math.log1p %323 : vector<8x128xf32>
    %327 = arith.addf %325, %326 : vector<8x128xf32>
    %328 = arith.subf %319, %327 : vector<8x128xf32>
    %329 = math.exp %328 : vector<8x128xf32>
    %330 = vector.broadcast %313 : f32 to vector<8x128xf32>
    %331 = arith.mulf %327, %330 : vector<8x128xf32>
    %332 = arith.addf %302, %331 : vector<8x128xf32>
    %333 = vector.broadcast %314 : f32 to vector<8x128xf32>
    %334 = arith.mulf %329, %333 : vector<8x128xf32>
    %335 = arith.addf %305, %334 : vector<8x128xf32>
    %336 = arith.mulf %329, %329 : vector<8x128xf32>
    %337 = arith.subf %329, %336 : vector<8x128xf32>
    %338 = vector.broadcast %315 : f32 to vector<8x128xf32>
    %339 = arith.mulf %337, %338 : vector<8x128xf32>
    %340 = arith.addf %310, %339 : vector<8x128xf32>
    %c11 = arith.constant 11 : index
    %341 = memref.load %arg1[%c11] : memref<128xf32, #tpu.memory_space<smem>>
    %c35 = arith.constant 35 : index
    %342 = memref.load %arg1[%c35] : memref<128xf32, #tpu.memory_space<smem>>
    %c59 = arith.constant 59 : index
    %343 = memref.load %arg1[%c59] : memref<128xf32, #tpu.memory_space<smem>>
    %c83 = arith.constant 83 : index
    %344 = memref.load %arg1[%c83] : memref<128xf32, #tpu.memory_space<smem>>
    %c107 = arith.constant 107 : index
    %345 = memref.load %arg1[%c107] : memref<128xf32, #tpu.memory_space<smem>>
    %346 = vector.broadcast %341 : f32 to vector<8x128xf32>
    %347 = arith.mulf %7, %346 : vector<8x128xf32>
    %348 = vector.broadcast %342 : f32 to vector<8x128xf32>
    %349 = arith.addf %347, %348 : vector<8x128xf32>
    %350 = math.absf %349 : vector<8x128xf32>
    %cst_26 = arith.constant 0.000000e+00 : f32
    %351 = vector.broadcast %cst_26 : f32 to vector<8x128xf32>
    %352 = arith.subf %351, %350 : vector<8x128xf32>
    %353 = math.exp %352 : vector<8x128xf32>
    %cst_27 = arith.constant 0.000000e+00 : f32
    %354 = vector.broadcast %cst_27 : f32 to vector<8x128xf32>
    %355 = arith.maximumf %349, %354 : vector<8x128xf32>
    %356 = math.log1p %353 : vector<8x128xf32>
    %357 = arith.addf %355, %356 : vector<8x128xf32>
    %358 = arith.subf %349, %357 : vector<8x128xf32>
    %359 = math.exp %358 : vector<8x128xf32>
    %360 = vector.broadcast %343 : f32 to vector<8x128xf32>
    %361 = arith.mulf %357, %360 : vector<8x128xf32>
    %362 = arith.addf %332, %361 : vector<8x128xf32>
    %363 = vector.broadcast %344 : f32 to vector<8x128xf32>
    %364 = arith.mulf %359, %363 : vector<8x128xf32>
    %365 = arith.addf %335, %364 : vector<8x128xf32>
    %366 = arith.mulf %359, %359 : vector<8x128xf32>
    %367 = arith.subf %359, %366 : vector<8x128xf32>
    %368 = vector.broadcast %345 : f32 to vector<8x128xf32>
    %369 = arith.mulf %367, %368 : vector<8x128xf32>
    %370 = arith.addf %340, %369 : vector<8x128xf32>
    %c12 = arith.constant 12 : index
    %371 = memref.load %arg1[%c12] : memref<128xf32, #tpu.memory_space<smem>>
    %c36 = arith.constant 36 : index
    %372 = memref.load %arg1[%c36] : memref<128xf32, #tpu.memory_space<smem>>
    %c60 = arith.constant 60 : index
    %373 = memref.load %arg1[%c60] : memref<128xf32, #tpu.memory_space<smem>>
    %c84 = arith.constant 84 : index
    %374 = memref.load %arg1[%c84] : memref<128xf32, #tpu.memory_space<smem>>
    %c108 = arith.constant 108 : index
    %375 = memref.load %arg1[%c108] : memref<128xf32, #tpu.memory_space<smem>>
    %376 = vector.broadcast %371 : f32 to vector<8x128xf32>
    %377 = arith.mulf %7, %376 : vector<8x128xf32>
    %378 = vector.broadcast %372 : f32 to vector<8x128xf32>
    %379 = arith.addf %377, %378 : vector<8x128xf32>
    %380 = math.absf %379 : vector<8x128xf32>
    %cst_28 = arith.constant 0.000000e+00 : f32
    %381 = vector.broadcast %cst_28 : f32 to vector<8x128xf32>
    %382 = arith.subf %381, %380 : vector<8x128xf32>
    %383 = math.exp %382 : vector<8x128xf32>
    %cst_29 = arith.constant 0.000000e+00 : f32
    %384 = vector.broadcast %cst_29 : f32 to vector<8x128xf32>
    %385 = arith.maximumf %379, %384 : vector<8x128xf32>
    %386 = math.log1p %383 : vector<8x128xf32>
    %387 = arith.addf %385, %386 : vector<8x128xf32>
    %388 = arith.subf %379, %387 : vector<8x128xf32>
    %389 = math.exp %388 : vector<8x128xf32>
    %390 = vector.broadcast %373 : f32 to vector<8x128xf32>
    %391 = arith.mulf %387, %390 : vector<8x128xf32>
    %392 = arith.addf %362, %391 : vector<8x128xf32>
    %393 = vector.broadcast %374 : f32 to vector<8x128xf32>
    %394 = arith.mulf %389, %393 : vector<8x128xf32>
    %395 = arith.addf %365, %394 : vector<8x128xf32>
    %396 = arith.mulf %389, %389 : vector<8x128xf32>
    %397 = arith.subf %389, %396 : vector<8x128xf32>
    %398 = vector.broadcast %375 : f32 to vector<8x128xf32>
    %399 = arith.mulf %397, %398 : vector<8x128xf32>
    %400 = arith.addf %370, %399 : vector<8x128xf32>
    %c13 = arith.constant 13 : index
    %401 = memref.load %arg1[%c13] : memref<128xf32, #tpu.memory_space<smem>>
    %c37 = arith.constant 37 : index
    %402 = memref.load %arg1[%c37] : memref<128xf32, #tpu.memory_space<smem>>
    %c61 = arith.constant 61 : index
    %403 = memref.load %arg1[%c61] : memref<128xf32, #tpu.memory_space<smem>>
    %c85 = arith.constant 85 : index
    %404 = memref.load %arg1[%c85] : memref<128xf32, #tpu.memory_space<smem>>
    %c109 = arith.constant 109 : index
    %405 = memref.load %arg1[%c109] : memref<128xf32, #tpu.memory_space<smem>>
    %406 = vector.broadcast %401 : f32 to vector<8x128xf32>
    %407 = arith.mulf %7, %406 : vector<8x128xf32>
    %408 = vector.broadcast %402 : f32 to vector<8x128xf32>
    %409 = arith.addf %407, %408 : vector<8x128xf32>
    %410 = math.absf %409 : vector<8x128xf32>
    %cst_30 = arith.constant 0.000000e+00 : f32
    %411 = vector.broadcast %cst_30 : f32 to vector<8x128xf32>
    %412 = arith.subf %411, %410 : vector<8x128xf32>
    %413 = math.exp %412 : vector<8x128xf32>
    %cst_31 = arith.constant 0.000000e+00 : f32
    %414 = vector.broadcast %cst_31 : f32 to vector<8x128xf32>
    %415 = arith.maximumf %409, %414 : vector<8x128xf32>
    %416 = math.log1p %413 : vector<8x128xf32>
    %417 = arith.addf %415, %416 : vector<8x128xf32>
    %418 = arith.subf %409, %417 : vector<8x128xf32>
    %419 = math.exp %418 : vector<8x128xf32>
    %420 = vector.broadcast %403 : f32 to vector<8x128xf32>
    %421 = arith.mulf %417, %420 : vector<8x128xf32>
    %422 = arith.addf %392, %421 : vector<8x128xf32>
    %423 = vector.broadcast %404 : f32 to vector<8x128xf32>
    %424 = arith.mulf %419, %423 : vector<8x128xf32>
    %425 = arith.addf %395, %424 : vector<8x128xf32>
    %426 = arith.mulf %419, %419 : vector<8x128xf32>
    %427 = arith.subf %419, %426 : vector<8x128xf32>
    %428 = vector.broadcast %405 : f32 to vector<8x128xf32>
    %429 = arith.mulf %427, %428 : vector<8x128xf32>
    %430 = arith.addf %400, %429 : vector<8x128xf32>
    %c14 = arith.constant 14 : index
    %431 = memref.load %arg1[%c14] : memref<128xf32, #tpu.memory_space<smem>>
    %c38 = arith.constant 38 : index
    %432 = memref.load %arg1[%c38] : memref<128xf32, #tpu.memory_space<smem>>
    %c62 = arith.constant 62 : index
    %433 = memref.load %arg1[%c62] : memref<128xf32, #tpu.memory_space<smem>>
    %c86 = arith.constant 86 : index
    %434 = memref.load %arg1[%c86] : memref<128xf32, #tpu.memory_space<smem>>
    %c110 = arith.constant 110 : index
    %435 = memref.load %arg1[%c110] : memref<128xf32, #tpu.memory_space<smem>>
    %436 = vector.broadcast %431 : f32 to vector<8x128xf32>
    %437 = arith.mulf %7, %436 : vector<8x128xf32>
    %438 = vector.broadcast %432 : f32 to vector<8x128xf32>
    %439 = arith.addf %437, %438 : vector<8x128xf32>
    %440 = math.absf %439 : vector<8x128xf32>
    %cst_32 = arith.constant 0.000000e+00 : f32
    %441 = vector.broadcast %cst_32 : f32 to vector<8x128xf32>
    %442 = arith.subf %441, %440 : vector<8x128xf32>
    %443 = math.exp %442 : vector<8x128xf32>
    %cst_33 = arith.constant 0.000000e+00 : f32
    %444 = vector.broadcast %cst_33 : f32 to vector<8x128xf32>
    %445 = arith.maximumf %439, %444 : vector<8x128xf32>
    %446 = math.log1p %443 : vector<8x128xf32>
    %447 = arith.addf %445, %446 : vector<8x128xf32>
    %448 = arith.subf %439, %447 : vector<8x128xf32>
    %449 = math.exp %448 : vector<8x128xf32>
    %450 = vector.broadcast %433 : f32 to vector<8x128xf32>
    %451 = arith.mulf %447, %450 : vector<8x128xf32>
    %452 = arith.addf %422, %451 : vector<8x128xf32>
    %453 = vector.broadcast %434 : f32 to vector<8x128xf32>
    %454 = arith.mulf %449, %453 : vector<8x128xf32>
    %455 = arith.addf %425, %454 : vector<8x128xf32>
    %456 = arith.mulf %449, %449 : vector<8x128xf32>
    %457 = arith.subf %449, %456 : vector<8x128xf32>
    %458 = vector.broadcast %435 : f32 to vector<8x128xf32>
    %459 = arith.mulf %457, %458 : vector<8x128xf32>
    %460 = arith.addf %430, %459 : vector<8x128xf32>
    %c15 = arith.constant 15 : index
    %461 = memref.load %arg1[%c15] : memref<128xf32, #tpu.memory_space<smem>>
    %c39 = arith.constant 39 : index
    %462 = memref.load %arg1[%c39] : memref<128xf32, #tpu.memory_space<smem>>
    %c63 = arith.constant 63 : index
    %463 = memref.load %arg1[%c63] : memref<128xf32, #tpu.memory_space<smem>>
    %c87 = arith.constant 87 : index
    %464 = memref.load %arg1[%c87] : memref<128xf32, #tpu.memory_space<smem>>
    %c111 = arith.constant 111 : index
    %465 = memref.load %arg1[%c111] : memref<128xf32, #tpu.memory_space<smem>>
    %466 = vector.broadcast %461 : f32 to vector<8x128xf32>
    %467 = arith.mulf %7, %466 : vector<8x128xf32>
    %468 = vector.broadcast %462 : f32 to vector<8x128xf32>
    %469 = arith.addf %467, %468 : vector<8x128xf32>
    %470 = math.absf %469 : vector<8x128xf32>
    %cst_34 = arith.constant 0.000000e+00 : f32
    %471 = vector.broadcast %cst_34 : f32 to vector<8x128xf32>
    %472 = arith.subf %471, %470 : vector<8x128xf32>
    %473 = math.exp %472 : vector<8x128xf32>
    %cst_35 = arith.constant 0.000000e+00 : f32
    %474 = vector.broadcast %cst_35 : f32 to vector<8x128xf32>
    %475 = arith.maximumf %469, %474 : vector<8x128xf32>
    %476 = math.log1p %473 : vector<8x128xf32>
    %477 = arith.addf %475, %476 : vector<8x128xf32>
    %478 = arith.subf %469, %477 : vector<8x128xf32>
    %479 = math.exp %478 : vector<8x128xf32>
    %480 = vector.broadcast %463 : f32 to vector<8x128xf32>
    %481 = arith.mulf %477, %480 : vector<8x128xf32>
    %482 = arith.addf %452, %481 : vector<8x128xf32>
    %483 = vector.broadcast %464 : f32 to vector<8x128xf32>
    %484 = arith.mulf %479, %483 : vector<8x128xf32>
    %485 = arith.addf %455, %484 : vector<8x128xf32>
    %486 = arith.mulf %479, %479 : vector<8x128xf32>
    %487 = arith.subf %479, %486 : vector<8x128xf32>
    %488 = vector.broadcast %465 : f32 to vector<8x128xf32>
    %489 = arith.mulf %487, %488 : vector<8x128xf32>
    %490 = arith.addf %460, %489 : vector<8x128xf32>
    %c16 = arith.constant 16 : index
    %491 = memref.load %arg1[%c16] : memref<128xf32, #tpu.memory_space<smem>>
    %c40 = arith.constant 40 : index
    %492 = memref.load %arg1[%c40] : memref<128xf32, #tpu.memory_space<smem>>
    %c64 = arith.constant 64 : index
    %493 = memref.load %arg1[%c64] : memref<128xf32, #tpu.memory_space<smem>>
    %c88 = arith.constant 88 : index
    %494 = memref.load %arg1[%c88] : memref<128xf32, #tpu.memory_space<smem>>
    %c112 = arith.constant 112 : index
    %495 = memref.load %arg1[%c112] : memref<128xf32, #tpu.memory_space<smem>>
    %496 = vector.broadcast %491 : f32 to vector<8x128xf32>
    %497 = arith.mulf %7, %496 : vector<8x128xf32>
    %498 = vector.broadcast %492 : f32 to vector<8x128xf32>
    %499 = arith.addf %497, %498 : vector<8x128xf32>
    %500 = math.absf %499 : vector<8x128xf32>
    %cst_36 = arith.constant 0.000000e+00 : f32
    %501 = vector.broadcast %cst_36 : f32 to vector<8x128xf32>
    %502 = arith.subf %501, %500 : vector<8x128xf32>
    %503 = math.exp %502 : vector<8x128xf32>
    %cst_37 = arith.constant 0.000000e+00 : f32
    %504 = vector.broadcast %cst_37 : f32 to vector<8x128xf32>
    %505 = arith.maximumf %499, %504 : vector<8x128xf32>
    %506 = math.log1p %503 : vector<8x128xf32>
    %507 = arith.addf %505, %506 : vector<8x128xf32>
    %508 = arith.subf %499, %507 : vector<8x128xf32>
    %509 = math.exp %508 : vector<8x128xf32>
    %510 = vector.broadcast %493 : f32 to vector<8x128xf32>
    %511 = arith.mulf %507, %510 : vector<8x128xf32>
    %512 = arith.addf %482, %511 : vector<8x128xf32>
    %513 = vector.broadcast %494 : f32 to vector<8x128xf32>
    %514 = arith.mulf %509, %513 : vector<8x128xf32>
    %515 = arith.addf %485, %514 : vector<8x128xf32>
    %516 = arith.mulf %509, %509 : vector<8x128xf32>
    %517 = arith.subf %509, %516 : vector<8x128xf32>
    %518 = vector.broadcast %495 : f32 to vector<8x128xf32>
    %519 = arith.mulf %517, %518 : vector<8x128xf32>
    %520 = arith.addf %490, %519 : vector<8x128xf32>
    %c17 = arith.constant 17 : index
    %521 = memref.load %arg1[%c17] : memref<128xf32, #tpu.memory_space<smem>>
    %c41 = arith.constant 41 : index
    %522 = memref.load %arg1[%c41] : memref<128xf32, #tpu.memory_space<smem>>
    %c65 = arith.constant 65 : index
    %523 = memref.load %arg1[%c65] : memref<128xf32, #tpu.memory_space<smem>>
    %c89 = arith.constant 89 : index
    %524 = memref.load %arg1[%c89] : memref<128xf32, #tpu.memory_space<smem>>
    %c113 = arith.constant 113 : index
    %525 = memref.load %arg1[%c113] : memref<128xf32, #tpu.memory_space<smem>>
    %526 = vector.broadcast %521 : f32 to vector<8x128xf32>
    %527 = arith.mulf %7, %526 : vector<8x128xf32>
    %528 = vector.broadcast %522 : f32 to vector<8x128xf32>
    %529 = arith.addf %527, %528 : vector<8x128xf32>
    %530 = math.absf %529 : vector<8x128xf32>
    %cst_38 = arith.constant 0.000000e+00 : f32
    %531 = vector.broadcast %cst_38 : f32 to vector<8x128xf32>
    %532 = arith.subf %531, %530 : vector<8x128xf32>
    %533 = math.exp %532 : vector<8x128xf32>
    %cst_39 = arith.constant 0.000000e+00 : f32
    %534 = vector.broadcast %cst_39 : f32 to vector<8x128xf32>
    %535 = arith.maximumf %529, %534 : vector<8x128xf32>
    %536 = math.log1p %533 : vector<8x128xf32>
    %537 = arith.addf %535, %536 : vector<8x128xf32>
    %538 = arith.subf %529, %537 : vector<8x128xf32>
    %539 = math.exp %538 : vector<8x128xf32>
    %540 = vector.broadcast %523 : f32 to vector<8x128xf32>
    %541 = arith.mulf %537, %540 : vector<8x128xf32>
    %542 = arith.addf %512, %541 : vector<8x128xf32>
    %543 = vector.broadcast %524 : f32 to vector<8x128xf32>
    %544 = arith.mulf %539, %543 : vector<8x128xf32>
    %545 = arith.addf %515, %544 : vector<8x128xf32>
    %546 = arith.mulf %539, %539 : vector<8x128xf32>
    %547 = arith.subf %539, %546 : vector<8x128xf32>
    %548 = vector.broadcast %525 : f32 to vector<8x128xf32>
    %549 = arith.mulf %547, %548 : vector<8x128xf32>
    %550 = arith.addf %520, %549 : vector<8x128xf32>
    %c18 = arith.constant 18 : index
    %551 = memref.load %arg1[%c18] : memref<128xf32, #tpu.memory_space<smem>>
    %c42 = arith.constant 42 : index
    %552 = memref.load %arg1[%c42] : memref<128xf32, #tpu.memory_space<smem>>
    %c66 = arith.constant 66 : index
    %553 = memref.load %arg1[%c66] : memref<128xf32, #tpu.memory_space<smem>>
    %c90 = arith.constant 90 : index
    %554 = memref.load %arg1[%c90] : memref<128xf32, #tpu.memory_space<smem>>
    %c114 = arith.constant 114 : index
    %555 = memref.load %arg1[%c114] : memref<128xf32, #tpu.memory_space<smem>>
    %556 = vector.broadcast %551 : f32 to vector<8x128xf32>
    %557 = arith.mulf %7, %556 : vector<8x128xf32>
    %558 = vector.broadcast %552 : f32 to vector<8x128xf32>
    %559 = arith.addf %557, %558 : vector<8x128xf32>
    %560 = math.absf %559 : vector<8x128xf32>
    %cst_40 = arith.constant 0.000000e+00 : f32
    %561 = vector.broadcast %cst_40 : f32 to vector<8x128xf32>
    %562 = arith.subf %561, %560 : vector<8x128xf32>
    %563 = math.exp %562 : vector<8x128xf32>
    %cst_41 = arith.constant 0.000000e+00 : f32
    %564 = vector.broadcast %cst_41 : f32 to vector<8x128xf32>
    %565 = arith.maximumf %559, %564 : vector<8x128xf32>
    %566 = math.log1p %563 : vector<8x128xf32>
    %567 = arith.addf %565, %566 : vector<8x128xf32>
    %568 = arith.subf %559, %567 : vector<8x128xf32>
    %569 = math.exp %568 : vector<8x128xf32>
    %570 = vector.broadcast %553 : f32 to vector<8x128xf32>
    %571 = arith.mulf %567, %570 : vector<8x128xf32>
    %572 = arith.addf %542, %571 : vector<8x128xf32>
    %573 = vector.broadcast %554 : f32 to vector<8x128xf32>
    %574 = arith.mulf %569, %573 : vector<8x128xf32>
    %575 = arith.addf %545, %574 : vector<8x128xf32>
    %576 = arith.mulf %569, %569 : vector<8x128xf32>
    %577 = arith.subf %569, %576 : vector<8x128xf32>
    %578 = vector.broadcast %555 : f32 to vector<8x128xf32>
    %579 = arith.mulf %577, %578 : vector<8x128xf32>
    %580 = arith.addf %550, %579 : vector<8x128xf32>
    %c19 = arith.constant 19 : index
    %581 = memref.load %arg1[%c19] : memref<128xf32, #tpu.memory_space<smem>>
    %c43 = arith.constant 43 : index
    %582 = memref.load %arg1[%c43] : memref<128xf32, #tpu.memory_space<smem>>
    %c67 = arith.constant 67 : index
    %583 = memref.load %arg1[%c67] : memref<128xf32, #tpu.memory_space<smem>>
    %c91 = arith.constant 91 : index
    %584 = memref.load %arg1[%c91] : memref<128xf32, #tpu.memory_space<smem>>
    %c115 = arith.constant 115 : index
    %585 = memref.load %arg1[%c115] : memref<128xf32, #tpu.memory_space<smem>>
    %586 = vector.broadcast %581 : f32 to vector<8x128xf32>
    %587 = arith.mulf %7, %586 : vector<8x128xf32>
    %588 = vector.broadcast %582 : f32 to vector<8x128xf32>
    %589 = arith.addf %587, %588 : vector<8x128xf32>
    %590 = math.absf %589 : vector<8x128xf32>
    %cst_42 = arith.constant 0.000000e+00 : f32
    %591 = vector.broadcast %cst_42 : f32 to vector<8x128xf32>
    %592 = arith.subf %591, %590 : vector<8x128xf32>
    %593 = math.exp %592 : vector<8x128xf32>
    %cst_43 = arith.constant 0.000000e+00 : f32
    %594 = vector.broadcast %cst_43 : f32 to vector<8x128xf32>
    %595 = arith.maximumf %589, %594 : vector<8x128xf32>
    %596 = math.log1p %593 : vector<8x128xf32>
    %597 = arith.addf %595, %596 : vector<8x128xf32>
    %598 = arith.subf %589, %597 : vector<8x128xf32>
    %599 = math.exp %598 : vector<8x128xf32>
    %600 = vector.broadcast %583 : f32 to vector<8x128xf32>
    %601 = arith.mulf %597, %600 : vector<8x128xf32>
    %602 = arith.addf %572, %601 : vector<8x128xf32>
    %603 = vector.broadcast %584 : f32 to vector<8x128xf32>
    %604 = arith.mulf %599, %603 : vector<8x128xf32>
    %605 = arith.addf %575, %604 : vector<8x128xf32>
    %606 = arith.mulf %599, %599 : vector<8x128xf32>
    %607 = arith.subf %599, %606 : vector<8x128xf32>
    %608 = vector.broadcast %585 : f32 to vector<8x128xf32>
    %609 = arith.mulf %607, %608 : vector<8x128xf32>
    %610 = arith.addf %580, %609 : vector<8x128xf32>
    %c20 = arith.constant 20 : index
    %611 = memref.load %arg1[%c20] : memref<128xf32, #tpu.memory_space<smem>>
    %c44 = arith.constant 44 : index
    %612 = memref.load %arg1[%c44] : memref<128xf32, #tpu.memory_space<smem>>
    %c68 = arith.constant 68 : index
    %613 = memref.load %arg1[%c68] : memref<128xf32, #tpu.memory_space<smem>>
    %c92 = arith.constant 92 : index
    %614 = memref.load %arg1[%c92] : memref<128xf32, #tpu.memory_space<smem>>
    %c116 = arith.constant 116 : index
    %615 = memref.load %arg1[%c116] : memref<128xf32, #tpu.memory_space<smem>>
    %616 = vector.broadcast %611 : f32 to vector<8x128xf32>
    %617 = arith.mulf %7, %616 : vector<8x128xf32>
    %618 = vector.broadcast %612 : f32 to vector<8x128xf32>
    %619 = arith.addf %617, %618 : vector<8x128xf32>
    %620 = math.absf %619 : vector<8x128xf32>
    %cst_44 = arith.constant 0.000000e+00 : f32
    %621 = vector.broadcast %cst_44 : f32 to vector<8x128xf32>
    %622 = arith.subf %621, %620 : vector<8x128xf32>
    %623 = math.exp %622 : vector<8x128xf32>
    %cst_45 = arith.constant 0.000000e+00 : f32
    %624 = vector.broadcast %cst_45 : f32 to vector<8x128xf32>
    %625 = arith.maximumf %619, %624 : vector<8x128xf32>
    %626 = math.log1p %623 : vector<8x128xf32>
    %627 = arith.addf %625, %626 : vector<8x128xf32>
    %628 = arith.subf %619, %627 : vector<8x128xf32>
    %629 = math.exp %628 : vector<8x128xf32>
    %630 = vector.broadcast %613 : f32 to vector<8x128xf32>
    %631 = arith.mulf %627, %630 : vector<8x128xf32>
    %632 = arith.addf %602, %631 : vector<8x128xf32>
    %633 = vector.broadcast %614 : f32 to vector<8x128xf32>
    %634 = arith.mulf %629, %633 : vector<8x128xf32>
    %635 = arith.addf %605, %634 : vector<8x128xf32>
    %636 = arith.mulf %629, %629 : vector<8x128xf32>
    %637 = arith.subf %629, %636 : vector<8x128xf32>
    %638 = vector.broadcast %615 : f32 to vector<8x128xf32>
    %639 = arith.mulf %637, %638 : vector<8x128xf32>
    %640 = arith.addf %610, %639 : vector<8x128xf32>
    %c21 = arith.constant 21 : index
    %641 = memref.load %arg1[%c21] : memref<128xf32, #tpu.memory_space<smem>>
    %c45 = arith.constant 45 : index
    %642 = memref.load %arg1[%c45] : memref<128xf32, #tpu.memory_space<smem>>
    %c69 = arith.constant 69 : index
    %643 = memref.load %arg1[%c69] : memref<128xf32, #tpu.memory_space<smem>>
    %c93 = arith.constant 93 : index
    %644 = memref.load %arg1[%c93] : memref<128xf32, #tpu.memory_space<smem>>
    %c117 = arith.constant 117 : index
    %645 = memref.load %arg1[%c117] : memref<128xf32, #tpu.memory_space<smem>>
    %646 = vector.broadcast %641 : f32 to vector<8x128xf32>
    %647 = arith.mulf %7, %646 : vector<8x128xf32>
    %648 = vector.broadcast %642 : f32 to vector<8x128xf32>
    %649 = arith.addf %647, %648 : vector<8x128xf32>
    %650 = math.absf %649 : vector<8x128xf32>
    %cst_46 = arith.constant 0.000000e+00 : f32
    %651 = vector.broadcast %cst_46 : f32 to vector<8x128xf32>
    %652 = arith.subf %651, %650 : vector<8x128xf32>
    %653 = math.exp %652 : vector<8x128xf32>
    %cst_47 = arith.constant 0.000000e+00 : f32
    %654 = vector.broadcast %cst_47 : f32 to vector<8x128xf32>
    %655 = arith.maximumf %649, %654 : vector<8x128xf32>
    %656 = math.log1p %653 : vector<8x128xf32>
    %657 = arith.addf %655, %656 : vector<8x128xf32>
    %658 = arith.subf %649, %657 : vector<8x128xf32>
    %659 = math.exp %658 : vector<8x128xf32>
    %660 = vector.broadcast %643 : f32 to vector<8x128xf32>
    %661 = arith.mulf %657, %660 : vector<8x128xf32>
    %662 = arith.addf %632, %661 : vector<8x128xf32>
    %663 = vector.broadcast %644 : f32 to vector<8x128xf32>
    %664 = arith.mulf %659, %663 : vector<8x128xf32>
    %665 = arith.addf %635, %664 : vector<8x128xf32>
    %666 = arith.mulf %659, %659 : vector<8x128xf32>
    %667 = arith.subf %659, %666 : vector<8x128xf32>
    %668 = vector.broadcast %645 : f32 to vector<8x128xf32>
    %669 = arith.mulf %667, %668 : vector<8x128xf32>
    %670 = arith.addf %640, %669 : vector<8x128xf32>
    %c22 = arith.constant 22 : index
    %671 = memref.load %arg1[%c22] : memref<128xf32, #tpu.memory_space<smem>>
    %c46 = arith.constant 46 : index
    %672 = memref.load %arg1[%c46] : memref<128xf32, #tpu.memory_space<smem>>
    %c70 = arith.constant 70 : index
    %673 = memref.load %arg1[%c70] : memref<128xf32, #tpu.memory_space<smem>>
    %c94 = arith.constant 94 : index
    %674 = memref.load %arg1[%c94] : memref<128xf32, #tpu.memory_space<smem>>
    %c118 = arith.constant 118 : index
    %675 = memref.load %arg1[%c118] : memref<128xf32, #tpu.memory_space<smem>>
    %676 = vector.broadcast %671 : f32 to vector<8x128xf32>
    %677 = arith.mulf %7, %676 : vector<8x128xf32>
    %678 = vector.broadcast %672 : f32 to vector<8x128xf32>
    %679 = arith.addf %677, %678 : vector<8x128xf32>
    %680 = math.absf %679 : vector<8x128xf32>
    %cst_48 = arith.constant 0.000000e+00 : f32
    %681 = vector.broadcast %cst_48 : f32 to vector<8x128xf32>
    %682 = arith.subf %681, %680 : vector<8x128xf32>
    %683 = math.exp %682 : vector<8x128xf32>
    %cst_49 = arith.constant 0.000000e+00 : f32
    %684 = vector.broadcast %cst_49 : f32 to vector<8x128xf32>
    %685 = arith.maximumf %679, %684 : vector<8x128xf32>
    %686 = math.log1p %683 : vector<8x128xf32>
    %687 = arith.addf %685, %686 : vector<8x128xf32>
    %688 = arith.subf %679, %687 : vector<8x128xf32>
    %689 = math.exp %688 : vector<8x128xf32>
    %690 = vector.broadcast %673 : f32 to vector<8x128xf32>
    %691 = arith.mulf %687, %690 : vector<8x128xf32>
    %692 = arith.addf %662, %691 : vector<8x128xf32>
    %693 = vector.broadcast %674 : f32 to vector<8x128xf32>
    %694 = arith.mulf %689, %693 : vector<8x128xf32>
    %695 = arith.addf %665, %694 : vector<8x128xf32>
    %696 = arith.mulf %689, %689 : vector<8x128xf32>
    %697 = arith.subf %689, %696 : vector<8x128xf32>
    %698 = vector.broadcast %675 : f32 to vector<8x128xf32>
    %699 = arith.mulf %697, %698 : vector<8x128xf32>
    %700 = arith.addf %670, %699 : vector<8x128xf32>
    %c23 = arith.constant 23 : index
    %701 = memref.load %arg1[%c23] : memref<128xf32, #tpu.memory_space<smem>>
    %c47 = arith.constant 47 : index
    %702 = memref.load %arg1[%c47] : memref<128xf32, #tpu.memory_space<smem>>
    %c71 = arith.constant 71 : index
    %703 = memref.load %arg1[%c71] : memref<128xf32, #tpu.memory_space<smem>>
    %c95 = arith.constant 95 : index
    %704 = memref.load %arg1[%c95] : memref<128xf32, #tpu.memory_space<smem>>
    %c119 = arith.constant 119 : index
    %705 = memref.load %arg1[%c119] : memref<128xf32, #tpu.memory_space<smem>>
    %706 = vector.broadcast %701 : f32 to vector<8x128xf32>
    %707 = arith.mulf %7, %706 : vector<8x128xf32>
    %708 = vector.broadcast %702 : f32 to vector<8x128xf32>
    %709 = arith.addf %707, %708 : vector<8x128xf32>
    %710 = math.absf %709 : vector<8x128xf32>
    %cst_50 = arith.constant 0.000000e+00 : f32
    %711 = vector.broadcast %cst_50 : f32 to vector<8x128xf32>
    %712 = arith.subf %711, %710 : vector<8x128xf32>
    %713 = math.exp %712 : vector<8x128xf32>
    %cst_51 = arith.constant 0.000000e+00 : f32
    %714 = vector.broadcast %cst_51 : f32 to vector<8x128xf32>
    %715 = arith.maximumf %709, %714 : vector<8x128xf32>
    %716 = math.log1p %713 : vector<8x128xf32>
    %717 = arith.addf %715, %716 : vector<8x128xf32>
    %718 = arith.subf %709, %717 : vector<8x128xf32>
    %719 = math.exp %718 : vector<8x128xf32>
    %720 = vector.broadcast %703 : f32 to vector<8x128xf32>
    %721 = arith.mulf %717, %720 : vector<8x128xf32>
    %722 = arith.addf %692, %721 : vector<8x128xf32>
    %723 = vector.broadcast %704 : f32 to vector<8x128xf32>
    %724 = arith.mulf %719, %723 : vector<8x128xf32>
    %725 = arith.addf %695, %724 : vector<8x128xf32>
    %726 = arith.mulf %719, %719 : vector<8x128xf32>
    %727 = arith.subf %719, %726 : vector<8x128xf32>
    %728 = vector.broadcast %705 : f32 to vector<8x128xf32>
    %729 = arith.mulf %727, %728 : vector<8x128xf32>
    %730 = arith.addf %700, %729 : vector<8x128xf32>
    %731 = vector.broadcast %0 : f32 to vector<8x128xf32>
    %732 = arith.mulf %731, %7 : vector<8x128xf32>
    %733 = arith.addf %722, %732 : vector<8x128xf32>
    %734 = vector.broadcast %1 : f32 to vector<8x128xf32>
    %735 = arith.addf %733, %734 : vector<8x128xf32>
    %736 = math.absf %735 : vector<8x128xf32>
    %cst_52 = arith.constant 0.000000e+00 : f32
    %737 = vector.broadcast %cst_52 : f32 to vector<8x128xf32>
    %738 = arith.subf %737, %736 : vector<8x128xf32>
    %739 = math.exp %738 : vector<8x128xf32>
    %cst_53 = arith.constant 0.000000e+00 : f32
    %740 = vector.broadcast %cst_53 : f32 to vector<8x128xf32>
    %741 = arith.maximumf %735, %740 : vector<8x128xf32>
    %742 = math.log1p %739 : vector<8x128xf32>
    %743 = arith.addf %741, %742 : vector<8x128xf32>
    %744 = arith.subf %735, %743 : vector<8x128xf32>
    %745 = math.exp %744 : vector<8x128xf32>
    %746 = vector.broadcast %0 : f32 to vector<8x128xf32>
    %747 = arith.addf %725, %746 : vector<8x128xf32>
    %748 = arith.mulf %745, %747 : vector<8x128xf32>
    %749 = arith.mulf %745, %745 : vector<8x128xf32>
    %750 = arith.subf %745, %749 : vector<8x128xf32>
    %751 = arith.mulf %747, %747 : vector<8x128xf32>
    %752 = arith.mulf %750, %751 : vector<8x128xf32>
    %753 = arith.mulf %745, %730 : vector<8x128xf32>
    %754 = arith.addf %752, %753 : vector<8x128xf32>
    %755 = arith.mulf %754, %7 : vector<8x128xf32>
    %756 = arith.subf %748, %755 : vector<8x128xf32>
    %757 = arith.index_cast %5 : i32 to index
    %c0_54 = arith.constant 0 : index
    %758 = vector.load %arg3[%757, %c0_54] : memref<8x128xf32, #tpu.memory_space<vmem>>, vector<8x128xf32>
    tpu.vector_store %arg3[%757, %c0_54], %756 {strides = array<i32>} : memref<8x128xf32, #tpu.memory_space<vmem>>, vector<8x128xf32>,
    %759 = arith.index_cast %5 : i32 to index
    %c0_55 = arith.constant 0 : index
    %760 = vector.load %arg4[%759, %c0_55] : memref<8x128xf32, #tpu.memory_space<vmem>>, vector<8x128xf32>
    tpu.vector_store %arg4[%759, %c0_55], %754 {strides = array<i32>} : memref<8x128xf32, #tpu.memory_space<vmem>>, vector<8x128xf32>,
    %c1_i32_56 = arith.constant 1 : i32
    return
  }
  func.func @transform_0(%arg0: i32) -> i32 {
    %c0_i32 = arith.constant 0 : i32
    %c0_i32_0 = arith.constant 0 : i32
    return %c0_i32 : i32
  }
  func.func @transform_1(%arg0: i32) -> (i32, i32) {
    %c0_i32 = arith.constant 0 : i32
    %c0_i32_0 = arith.constant 0 : i32
    return %arg0, %c0_i32 : i32, i32
  }
  func.func @transform_2(%arg0: i32) -> (i32, i32) {
    %c0_i32 = arith.constant 0 : i32
    %c0_i32_0 = arith.constant 0 : i32
    return %arg0, %c0_i32 : i32, i32
  }
  func.func @transform_3(%arg0: i32) -> (i32, i32) {
    %c0_i32 = arith.constant 0 : i32
    %c0_i32_0 = arith.constant 0 : i32
    return %arg0, %c0_i32 : i32, i32
  }
}

</mosaic_0001>

<bundles_post_ra>
// kernel: icnn_eval_flat.1
= control target key start
LH: loop header
LB: loop body
LE: loop exit
PB: predicated region body
PF: predicated region fallthrough
CT: control target
= control target key end

     0   :  { %9 = vsyncpa [#allocation3], 0  ;;  %s2183_s0 = inlined_call_operand.vmem [shape: f32[128], index: 0, kind: input, shape index: {}]   ;;  %s2184_s1 = inlined_call_operand.vmem [shape: f32[8,128], index: 1, kind: input, shape index: {}]   ;;  %s2185_s2 = inlined_call_operand.vmem [shape: f32[8,128], index: 2, kind: output, shape index: {0}]   ;;  %s2186_s3 = inlined_call_operand.vmem [shape: f32[8,128], index: 3, kind: output, shape index: {1}]  }
   0x1   :  { %s16_s14 = sshll.u32 %s2183_s0, 4  ;;  %s17_s14 = int_to_ptr.vmem [resolvable:$true] %s16_s14 }
   0x2   :  { %s1258_s15 = scalar_lea.vmem %s17_s14, 16  ;;  %p1263_p1 = scmp.lt.s32.totalorder %s17_s14, %s17_s14 }
   0x3   :  { %p1259_p0 = scmp.ne.s32.totalorder %s17_s14, %s1258_s15  ;;  %p1264_p2 = scmp.lt.s32.totalorder %s1258_s15, %s1258_s15 }
   0x5   :  { %p1265_p3 = por %p1264_p2, %p1263_p1 }
   0x7   :  { %p1266_p4 = pnand %p1265_p3, %p1259_p0 }
   0x9   :  { %1269 = shalt.err (!%p1266_p4)
}
   0xa   :  { %s1272_s16 = smov [#allocation2]  }
   0xb   :  { %19 = dma.vmem_to_smem %s17_s14, 16, %s1272_s16, [#allocation3]  }
   0xc   :  { %1270 = dma.done.wait [#allocation3], 16  }
   0xd   :  { %1271 = vsyncadd [#allocation3], 4294967280 }
   0xe   :  { %25 = sfence }
   0xf   :  { %s29_s17 = sld [smem:[#allocation2]]  ;;  %v1299_v0 = vld [vmem:[%s2184_s1] sm:$0xff] }
  0x10   :  { %s987_s18 = sld [smem:[#allocation2 + $0x18]] }
  0x11   :  { %s991_s0 = sld [smem:[#allocation2 + $0x1]] }
  0x12   :  { %s992_s21 = sld [smem:[#allocation2 + $0x19]] }
  0x13   :  { %s996_s22 = sld [smem:[#allocation2 + $0x2]] }
  0x14   :  { %s997_s23 = sld [smem:[#allocation2 + $0x1a]] }
  0x15   :  { %v34_v1 = vstv %s29_s17  ;;  %s1001_s24 = sld [smem:[#allocation2 + $0x3]] }
  0x16   :  { %v35_v2 = vmul.f32 %v34_v1, %v1299_v0  ;;  %v36_v3 = vstv %s987_s18  ;;  %s1002_s25 = sld [smem:[#allocation2 + $0x1b]] }
  0x17   :  { %v72_v6 = vstv %s991_s0  ;;  %s1006_s26 = sld [smem:[#allocation2 + $0x4]] }
  0x18   :  { %v1302_v4 = vadd.f32 %v36_v3, %v35_v2  ;;  %v73_v7 = vmul.f32 %v72_v6, %v1299_v0  ;;  %v74_v8 = vstv %s992_s21  ;;  %s1007_s27 = sld [smem:[#allocation2 + $0x1c]] }
  0x19   :  { %v110_v13 = vstv %s996_s22  ;;  %s1011_s28 = sld [smem:[#allocation2 + $0x5]] }
  0x1a   :  { %v38_v5 = vand.u32 2147483647, %v1302_v4  ;;  %v1306_v10 = vadd.f32 %v74_v8, %v73_v7  ;;  %v111_v14 = vmul.f32 %v110_v13, %v1299_v0  ;;  %v112_v15 = vstv %s997_s23  ;;  %s1012_s29 = sld [smem:[#allocation2 + $0x1d]] }
  0x1b   :  { %v148_v20 = vstv %s1001_s24  ;;  %s1016_s30 = sld [smem:[#allocation2 + $0x6]]  ;;  %v42_v62 = vmax.f32 %v1302_v4, 0.0 }
  0x1c   :  { %v39_v9 = vsub.f32 0.0, %v38_v5  ;;  %v76_v12 = vand.u32 2147483647, %v1306_v10  ;;  %v1310_v17 = vadd.f32 %v112_v15, %v111_v14  ;;  %v149_v21 = vmul.f32 %v148_v20, %v1299_v0  ;;  %s1017_s4 = sld [smem:[#allocation2 + $0x1e]] }
  0x1d   :  { %v150_v22 = vstv %s1002_s25  ;;  %v186_v27 = vstv %s1006_s26  ;;  %s1021_s5 = sld [smem:[#allocation2 + $0x7]]  ;;  %v80_v15 = vmax.f32 %v1306_v10, 0.0 }
  0x1e   :  { %v40_v11 = vmul.f32 1.442695, %v39_v9  ;;  %v77_v16 = vsub.f32 0.0, %v76_v12  ;;  %v114_v19 = vand.u32 2147483647, %v1310_v17  ;;  %v1314_v24 = vadd.f32 %v150_v22, %v149_v21  ;;  %s1324_s6 = sld [smem:[#allocation2 + $0x1f]] }
  0x1f   :  { %v187_v28 = vmul.f32 %v186_v27, %v1299_v0  ;;  %v188_v29 = vstv %s1007_s27  ;;  %v224_v36 = vstv %s1011_s28  ;;  %s1327_s7 = sld [smem:[#allocation2 + $0x30]] }
  0x20   :  { %1107 = vpow2.f32 %v40_v11  ;;  %v78_v18 = vmul.f32 1.442695, %v77_v16  ;;  %v115_v23 = vsub.f32 0.0, %v114_v19  ;;  %v152_v26 = vand.u32 2147483647, %v1314_v24  ;;  %s1332_s8 = sld [smem:[#allocation2 + $0x48]] }
  0x21   :  { %v1318_v31 = vadd.f32 %v188_v29, %v187_v28  ;;  %v226_v38 = vstv %s1012_s29  ;;  %v225_v39 = vmul.f32 %v224_v36, %v1299_v0  ;;  %v262_v45 = vstv %s1016_s30  ;;  %s1337_s9 = sld [smem:[#allocation2 + $0x8]] }
  0x22   :  { %1109 = vpow2.f32 %v78_v18  ;;  %v116_v25 = vmul.f32 1.442695, %v115_v23  ;;  %v153_v30 = vsub.f32 0.0, %v152_v26  ;;  %v263_v47 = vmul.f32 %v262_v45, %v1299_v0  ;;  %s1339_s10 = sld [smem:[#allocation2 + $0x60]] }
  0x23   :  { %v190_v35 = vand.u32 2147483647, %v1318_v31  ;;  %v1322_v43 = vadd.f32 %v226_v38, %v225_v39  ;;  %v264_v48 = vstv %s1017_s4  ;;  %v300_v57 = vstv %s1021_s5  ;;  %s1344_s11 = sld [smem:[#allocation2 + $0x20]] }
  0x24   :  { %1111 = vpow2.f32 %v116_v25  ;;  %v154_v33 = vmul.f32 1.442695, %v153_v30  ;;  %v1335_v54 = vadd.f32 %v264_v48, %v263_v47  ;;  %v301_v59 = vmul.f32 %v300_v57, %v1299_v0  ;;  %s1349_s12 = sld [smem:[#allocation2 + $0x31]] }
  0x25   :  { %v191_v37 = vsub.f32 0.0, %v190_v35  ;;  %v228_v46 = vand.u32 2147483647, %v1322_v43  ;;  %v302_v60 = vstv %s1324_s6  ;;  %s1355_s13 = sld [smem:[#allocation2 + $0x49]]  ;;  %v56_v11 = vstv %s1327_s7 }
  0x26   :  { %1113 = vpow2.f32 %v154_v33  ;;  %v266_v58 = vand.u32 2147483647, %v1335_v54  ;;  %v1358_v8 = vadd.f32 %v302_v60, %v301_v59  ;;  %v59_v14 = vstv %s1332_s8  ;;  %s1363_s14 = sld [smem:[#allocation2 + $0x61]] }
  0x27   :  { %v192_v41 = vmul.f32 1.442695, %v191_v37  ;;  %v229_v50 = vsub.f32 0.0, %v228_v46  ;;  %v338_v20 = vstv %s1337_s9  ;;  %s1374_s15 = sld [smem:[#allocation2 + $0x9]] }
  0x28   :  { %v267_v2 = vsub.f32 0.0, %v266_v58  ;;  %v304_v16 = vand.u32 2147483647, %v1358_v8  ;;  %s1380_s16 = sld [smem:[#allocation2 + $0x32]]  ;;  %v339_v26 = vmul.f32 %v338_v20, %v1299_v0  ;;  %v64_v37 = vstv %s1339_s10 }
  0x29   :  { %v230_v56 = vmul.f32 1.442695, %v229_v50  ;;  %s1393_s17 = sld [smem:[#allocation2 + $0x21]] }
  0x2a   :  { %v268_v13 = vmul.f32 1.442695, %v267_v2  ;;  %v305_v25 = vsub.f32 0.0, %v304_v16  ;;  %v94_v38 = vstv %s1349_s12  ;;  %s1397_s18 = sld [smem:[#allocation2 + $0x4a]] }
  0x2b   :  { %s1402_s19 = sld [smem:[#allocation2 + $0x62]]  ;;  %v97_v57 = vstv %s1355_s13 }
  0x2c   :  { %v306_v36 = vmul.f32 1.442695, %v305_v25  ;;  %s1410_s20 = sld [smem:[#allocation2 + $0x33]]  ;;  %v102_v58 = vstv %s1363_s14 }
  0x2d   :  { %v1108_v32 = vpop.eup %1107  ;;  %s1418_s0 = sld [smem:[#allocation2 + $0x4b]] }
  0x2e   :  { %v43_v34 = vadd.f32 1.0, %v1108_v32  ;;  %v46_v44 = vmul.f32 -0.5, %v1108_v32  ;;  %v49_v52 = vand.u32 2147483647, %v1108_v32  ;;  %v132_v59 = vstv %s1380_s16  ;;  %s1424_s21 = sld [smem:[#allocation2 + $0x63]] }
  0x2f   :  { %v1110_v40 = vpop.eup %1109  ;;  %s1433_s22 = sld [smem:[#allocation2 + $0x4c]] }
  0x30   :  { %1115 = vlog2.f32 %v43_v34  ;;  %v81_v42 = vadd.f32 1.0, %v1110_v40  ;;  %v47_v51 = vadd.f32 1.0, %v46_v44  ;;  %v84_v55 = vmul.f32 -0.5, %v1110_v40  ;;  %s1441_s23 = sld [smem:[#allocation2 + $0xa]] }
  0x31   :  { %1117 = vpow2.f32 %v192_v41  ;;  %v1330_v49 = vpop.eup %1111  ;;  %v87_v1 = vand.u32 2147483647, %v1110_v40  ;;  %vm1351_vm0 = vcmp.lt.f32.partialorder %v49_v52, 0.0004427343  ;;  %v140_v19 = vstv %s1402_s19  ;;  %s1450_s24 = sld [smem:[#allocation2 + $0x64]] }
  0x32   :  { %1119 = vlog2.f32 %v81_v42  ;;  %v119_v53 = vadd.f32 1.0, %v1330_v49  ;;  %v48_v63 = vmul.f32 %v1108_v32, %v47_v51  ;;  %v85_v6 = vadd.f32 1.0, %v84_v55  ;;  %s1457_s25 = sld [smem:[#allocation2 + $0x4d]] }
  0x33   :  { %v1346_v61 = vpop.eup %1113  ;;  %v122_v12 = vmul.f32 -0.5, %v1330_v49  ;;  %vm1369_vm1 = vcmp.lt.f32.partialorder %v87_v1, 0.0004427343  ;;  %v125_v29 = vand.u32 2147483647, %v1330_v49  ;;  %v340_v32 = vstv %s1344_s11  ;;  %s1465_s26 = sld [smem:[#allocation2 + $0x22]] }
  0x34   :  { %1121 = vlog2.f32 %v119_v53  ;;  %v157_v7 = vadd.f32 1.0, %v1346_v61  ;;  %v86_v23 = vmul.f32 %v1110_v40, %v85_v6  ;;  %v160_v35 = vmul.f32 -0.5, %v1346_v61  ;;  %s1500_s27 = sld [smem:[#allocation2 + $0xb]] }
  0x35   :  { %1123 = vpow2.f32 %v230_v56  ;;  %v123_v28 = vadd.f32 1.0, %v122_v12  ;;  %v1391_v39 = vadd.f32 %v340_v32, %v339_v26  ;;  %v118_v42 = vmax.f32 %v1310_v17, 0.0  ;;  %s1513_s28 = sld [smem:[#allocation2 + $0x65]] }
  0x36   :  { %1125 = vlog2.f32 %v157_v7  ;;  %vm1405_vm2 = vcmp.lt.f32.partialorder %v125_v29, 0.0004427343  ;;  %v161_v48 = vadd.f32 1.0, %v160_v35  ;;  %v163_v50 = vand.u32 2147483647, %v1346_v61  ;;  %s1521_s29 = sld [smem:[#allocation2 + $0x23]] }
  0x37   :  { %1127 = vpow2.f32 %v268_v13  ;;  %v124_v44 = vmul.f32 %v1330_v49, %v123_v28  ;;  %v342_v46 = vand.u32 2147483647, %v1391_v39  ;;  %v376_v56 = vstv %s1374_s15  ;;  %s1536_s30 = sld [smem:[#allocation2 + $0x4e]] }
  0x38   :  { %v377_v5 = vmul.f32 %v376_v56, %v1299_v0  ;;  %vm1436_vm3 = vcmp.lt.f32.partialorder %v163_v50, 0.0004427343  ;;  %v378_v12 = vstv %s1393_s17  ;;  %v173_v29 = vstv %s1418_s0  ;;  %s1545_s4 = sld [smem:[#allocation2 + $0x66]] }
  0x39   :  { %v343_v55 = vsub.f32 0.0, %v342_v46  ;;  %v232_v56 = vmax.f32 %v1322_v43, 0.0  ;;  %s1565_s5 = sld [smem:[#allocation2 + $0xc]] }
  0x3a   :  { %s1570_s6 = sld [smem:[#allocation2 + $0x24]] }
  0x3b   :  { %v344_v1 = vmul.f32 1.442695, %v343_v55  ;;  %s1577_s8 = sld [smem:[#allocation2 + $0x4f]] }
  0x3c   :  { %s1590_s9 = sld [smem:[#allocation2 + $0xd]] }
  0x3d   :  { %v1116_v3 = vpop.eup %1115  ;;  %s1593_s10 = sld [smem:[#allocation2 + $0x25]] }
  0x3e   :  { %v45_v9 = vmul.f32 0.6931472, %v1116_v3  ;;  %v1376_v21 = vpop.eup %1117  ;;  %v162_v3 = vmul.f32 %v1346_v61, %v161_v48  ;;  %s1603_s7 = sld [smem:[#allocation2 + $0x34]] }
  0x3f   :  { %v1120_v27 = vpop.eup %1119  ;;  %v195_v30 = vadd.f32 1.0, %v1376_v21  ;;  %v198_v51 = vmul.f32 -0.5, %v1376_v21  ;;  %s1610_s11 = sld [smem:[#allocation2 + $0x35]] }
  0x40   :  { %v51_v18 = vsel %vm1351_vm0, %v48_v63, %v45_v9  ;;  %v83_v34 = vmul.f32 0.6931472, %v1120_v27  ;;  %v170_v27 = vstv %s1410_s20  ;;  %s1615_s12 = sld [smem:[#allocation2 + $0x36]] }
  0x41   :  { %v1378_v22 = vadd.f32 %v51_v18, %v42_v62  ;;  %1129 = vlog2.f32 %v195_v30  ;;  %v1122_v47 = vpop.eup %1121  ;;  %v199_v9 = vadd.f32 1.0, %v198_v51  ;;  %v201_v18 = vand.u32 2147483647, %v1376_v21  ;;  %s1622_s13 = sld [smem:[#allocation2 + $0x37]] }
  0x42   :  { %v89_v41 = vsel %vm1369_vm1, %v86_v23, %v83_v34  ;;  %1131 = vpow2.f32 %v306_v36  ;;  %v1414_v52 = vpop.eup %1123  ;;  %v121_v53 = vmul.f32 0.6931472, %v1122_v47  ;;  %s1626_s14 = sld [smem:[#allocation2 + $0x67]] }
  0x43   :  { %v53_v33 = vsub.f32 %v1302_v4, %v1378_v22  ;;  %v1400_v4 = vadd.f32 %v89_v41, %v80_v15  ;;  %v233_v60 = vadd.f32 1.0, %v1414_v52  ;;  %v1126_v6 = vpop.eup %1125  ;;  %v135_v15 = vstv %s1397_s18  ;;  %s1632_s15 = sld [smem:[#allocation2 + $0x38]] }
  0x44   :  { %v127_v63 = vsel %vm1405_vm2, %v124_v44, %v121_v53  ;;  %v1443_v13 = vpop.eup %1127  ;;  %v159_v16 = vmul.f32 0.6931472, %v1126_v6  ;;  %v236_v20 = vmul.f32 -0.5, %v1414_v52  ;;  %v200_v30 = vmul.f32 %v1376_v21, %v199_v9  ;;  %s1637_s16 = sld [smem:[#allocation2 + $0x50]] }
  0x45   :  { %v54_v40 = vmul.f32 1.442695, %v53_v33  ;;  %v91_v49 = vsub.f32 %v1306_v10, %v1400_v4  ;;  %v156_v10 = vmax.f32 %v1314_v24, 0.0  ;;  %v1430_v2 = vadd.f32 %v127_v63, %v118_v42  ;;  %s1644_s17 = sld [smem:[#allocation2 + $0x68]] }
  0x46   :  { %v271_v23 = vadd.f32 1.0, %v1443_v13  ;;  %v165_v26 = vsel %vm1436_vm3, %v162_v3, %v159_v16  ;;  %v194_v33 = vmax.f32 %v1318_v31, 0.0  ;;  %vm1468_vm4 = vcmp.lt.f32.partialorder %v201_v18, 0.0004427343  ;;  %s1655_s18 = sld [smem:[#allocation2 + $0xe]] }
  0x47   :  { %1133 = vpow2.f32 %v54_v40  ;;  %v92_v62 = vmul.f32 1.442695, %v91_v49  ;;  %v129_v61 = vsub.f32 %v1310_v17, %v1430_v2  ;;  %v1459_v17 = vadd.f32 %v378_v12, %v377_v5  ;;  %s1660_s19 = sld [smem:[#allocation2 + $0x26]] }
  0x48   :  { %1135 = vlog2.f32 %v233_v60  ;;  %v1461_v28 = vadd.f32 %v165_v26, %v156_v10  ;;  %v237_v41 = vadd.f32 1.0, %v236_v20  ;;  %v239_v42 = vand.u32 2147483647, %v1414_v52  ;;  %s1664_s0 = sld [smem:[#allocation2 + $0x39]] }
  0x49   :  { %1137 = vpow2.f32 %v92_v62  ;;  %v130_v25 = vmul.f32 1.442695, %v129_v61  ;;  %v380_v35 = vand.u32 2147483647, %v1459_v17  ;;  %v178_v44 = vstv %s1424_s21  ;;  %s1669_s20 = sld [smem:[#allocation2 + $0x51]] }
  0x4a   :  { %1139 = vpow2.f32 %v344_v1  ;;  %v167_v21 = vsub.f32 %v1314_v24, %v1461_v28  ;;  %v274_v45 = vmul.f32 -0.5, %v1443_v13  ;;  %v211_v49 = vstv %s1433_s22  ;;  %s1678_s21 = sld [smem:[#allocation2 + $0xf]] }
  0x4b   :  { %1141 = vlog2.f32 %v271_v23  ;;  %v381_v47 = vsub.f32 0.0, %v380_v35  ;;  %v414_v53 = vstv %s1441_s23  ;;  %v238_v60 = vmul.f32 %v1414_v52, %v237_v41  ;;  %s1681_s22 = sld [smem:[#allocation2 + $0x27]] }
  0x4c   :  { %1143 = vpow2.f32 %v130_v25  ;;  %v168_v50 = vmul.f32 1.442695, %v167_v21  ;;  %vm1489_vm5 = vcmp.lt.f32.partialorder %v239_v42, 0.0004427343  ;;  %v275_v3 = vadd.f32 1.0, %v274_v45  ;;  %s1690_s23 = sld [smem:[#allocation2 + $0x10]] }
  0x4d   :  { %v382_v63 = vmul.f32 1.442695, %v381_v47  ;;  %v415_v5 = vmul.f32 %v414_v53, %v1299_v0  ;;  %v277_v52 = vand.u32 2147483647, %v1443_v13  ;;  %v416_v9 = vstv %s1465_s26  ;;  %s1708_s26 = sld [smem:[#allocation2 + $0x3a]] }
  0x4e   :  { %v1130_v32 = vpop.eup %1129  ;;  %v216_v16 = vstv %s1450_s24  ;;  %v249_v25 = vstv %s1457_s25  ;;  %v452_v62 = vstv %s1500_s27  ;;  %s1698_s24 = sld [smem:[#allocation2 + $0x28]] }
  0x4f   :  { %v1473_v36 = vpop.eup %1131  ;;  %v197_v40 = vmul.f32 0.6931472, %v1130_v32  ;;  %v1507_v26 = vadd.f32 %v416_v9, %v415_v5  ;;  %vm1524_vm6 = vcmp.lt.f32.partialorder %v277_v52, 0.0004427343  ;;  %s1702_s25 = sld [smem:[#allocation2 + $0x69]] }
  0x50   :  { %v309_v46 = vadd.f32 1.0, %v1473_v36  ;;  %s1714_s27 = sld [smem:[#allocation2 + $0x52]] }
  0x51   :  { %v203_v51 = vsel %vm1468_vm4, %v200_v30, %v197_v40 }
  0x52   :  { %v1485_v24 = vadd.f32 %v203_v51, %v194_v33  ;;  %1145 = vlog2.f32 %v309_v46  ;;  %v276_v33 = vmul.f32 %v1443_v13, %v275_v3  ;;  %v315_v13 = vand.u32 2147483647, %v1473_v36 }
  0x53   :  { %1147 = vpow2.f32 %v168_v50  ;;  %v418_v50 = vand.u32 2147483647, %v1507_v26 }
  0x54   :  { %v1134_v48 = vpop.eup %1133  ;;  %v205_v1 = vsub.f32 %v1318_v31, %v1485_v24  ;;  %1149 = vpow2.f32 %v382_v63  ;;  %v312_v31 = vmul.f32 -0.5, %v1473_v36  ;;  %vm1547_vm7 = vcmp.lt.f32.partialorder %v315_v13, 0.0004427343 }
  0x55   :  { %v62_v55 = vmul.f32 %v1134_v48, %v1134_v48  ;;  %v1136_v6 = vpop.eup %1135  ;;  %v60_v7 = vmul.f32 %v1134_v48, %v59_v14 }
  0x56   :  { %v1138_v12 = vpop.eup %1137  ;;  %v206_v61 = vmul.f32 1.442695, %v205_v1  ;;  %v235_v18 = vmul.f32 0.6931472, %v1136_v6  ;;  %v313_v42 = vadd.f32 1.0, %v312_v31  ;;  %v419_v6 = vsub.f32 0.0, %v418_v50 }
  0x57   :  { %v63_v10 = vsub.f32 %v1134_v48, %v62_v55  ;;  %v98_v20 = vmul.f32 %v1138_v12, %v97_v57  ;;  %v100_v23 = vmul.f32 %v1138_v12, %v1138_v12  ;;  %v1509_v30 = vpop.eup %1139  ;;  %v308_v55 = vmax.f32 %v1358_v8, 0.0 }
  0x58   :  { %1151 = vpow2.f32 %v206_v61  ;;  %v241_v32 = vsel %vm1489_vm5, %v238_v60, %v235_v18  ;;  %v347_v21 = vadd.f32 1.0, %v1509_v30  ;;  %v1142_v40 = vpop.eup %1141  ;;  %v350_v5 = vmul.f32 -0.5, %v1509_v30 }
  0x59   :  { %v65_v14 = vmul.f32 %v64_v37, %v63_v10  ;;  %v99_v34 = vadd.f32 %v98_v20, %v60_v7  ;;  %v101_v57 = vsub.f32 %v1138_v12, %v100_v23  ;;  %v1518_v35 = vadd.f32 %v241_v32, %v232_v56  ;;  %v1144_v45 = vpop.eup %1143 }
  0x5a   :  { %v270_v37 = vmax.f32 %v1335_v54, 0.0  ;;  %v273_v48 = vmul.f32 0.6931472, %v1142_v40  ;;  %v136_v51 = vmul.f32 %v1144_v45, %v135_v15  ;;  %v138_v53 = vmul.f32 %v1144_v45, %v1144_v45 }
  0x5b   :  { %v103_v46 = vmul.f32 %v102_v58, %v101_v57  ;;  %v243_v47 = vsub.f32 %v1322_v43, %v1518_v35  ;;  %1153 = vlog2.f32 %v347_v21  ;;  %v314_v15 = vmul.f32 %v1473_v36, %v313_v42 }
  0x5c   :  { %v279_v58 = vsel %vm1524_vm6, %v276_v33, %v273_v48  ;;  %v137_v43 = vadd.f32 %v136_v51, %v99_v34  ;;  %v139_v63 = vsub.f32 %v1144_v45, %v138_v53  ;;  %v453_v36 = vmul.f32 %v452_v62, %v1299_v0 }
  0x5d   :  { %v104_v56 = vadd.f32 %v103_v46, %v65_v14  ;;  %v244_v60 = vmul.f32 1.442695, %v243_v47  ;;  %v1542_v10 = vadd.f32 %v279_v58, %v270_v37  ;;  %v254_v31 = vstv %s1513_s28  ;;  %s1720_s28 = sld [smem:[#allocation2 + $0x6a]] }
  0x5e   :  { %v141_v52 = vmul.f32 %v140_v19, %v139_v63  ;;  %v454_v20 = vstv %s1521_s29  ;;  %v420_v33 = vmul.f32 1.442695, %v419_v6  ;;  %v287_v21 = vstv %s1536_s30  ;;  %s1729_s29 = sld [smem:[#allocation2 + $0x3b]] }
  0x5f   :  { %v1146_v1 = vpop.eup %1145  ;;  %1155 = vpow2.f32 %v244_v60  ;;  %v281_v9 = vsub.f32 %v1335_v54, %v1542_v10  ;;  %v351_v40 = vadd.f32 1.0, %v350_v5  ;;  %v1573_v37 = vadd.f32 %v454_v20, %v453_v36  ;;  %s1740_s30 = sld [smem:[#allocation2 + $0x53]] }
  0x60   :  { %v1148_v7 = vpop.eup %1147  ;;  %v311_v12 = vmul.f32 0.6931472, %v1146_v1  ;;  %v142_v14 = vadd.f32 %v141_v52, %v104_v56  ;;  %v353_v45 = vand.u32 2147483647, %v1509_v30  ;;  %v57_v46 = vmul.f32 %v56_v11, %v1378_v22 }
  0x61   :  { %v174_v61 = vmul.f32 %v1148_v7, %v173_v29  ;;  %v176_v18 = vmul.f32 %v1148_v7, %v1148_v7  ;;  %v1561_v23 = vpop.eup %1149  ;;  %v282_v32 = vmul.f32 1.442695, %v281_v9  ;;  %v95_v47 = vmul.f32 %v94_v38, %v1400_v4 }
  0x62   :  { %v317_v19 = vsel %vm1547_vm7, %v314_v15, %v311_v12  ;;  %v385_v57 = vadd.f32 1.0, %v1561_v23  ;;  %v292_v51 = vstv %s1545_s4  ;;  %v352_v11 = vmul.f32 %v1509_v30, %v351_v40  ;;  %s1744_s4 = sld [smem:[#allocation2 + $0x11]] }
  0x63   :  { %v175_v54 = vadd.f32 %v174_v61, %v137_v43  ;;  %v177_v34 = vsub.f32 %v1148_v7, %v176_v18  ;;  %v1567_v29 = vadd.f32 %v317_v19, %v308_v55  ;;  %1157 = vpow2.f32 %v282_v32 }
  0x64   :  { %1159 = vlog2.f32 %v385_v57  ;;  %v456_v22 = vand.u32 2147483647, %v1573_v37  ;;  %v346_v4 = vmax.f32 %v1391_v39, 0.0  ;;  %vm1598_vm8 = vcmp.lt.f32.partialorder %v353_v45, 0.0004427343 }
  0x65   :  { %v1152_v41 = vpop.eup %1151  ;;  %v179_v42 = vmul.f32 %v178_v44, %v177_v34  ;;  %v319_v13 = vsub.f32 %v1358_v8, %v1567_v29  ;;  %1161 = vpow2.f32 %v420_v33  ;;  %v388_v56 = vmul.f32 -0.5, %v1561_v23 }
  0x66   :  { %v212_v48 = vmul.f32 %v1152_v41, %v211_v49  ;;  %v214_v50 = vmul.f32 %v1152_v41, %v1152_v41  ;;  %v96_v60 = vadd.f32 %v95_v47, %v57_v46  ;;  %v457_v62 = vsub.f32 0.0, %v456_v22 }
  0x67   :  { %v180_v44 = vadd.f32 %v179_v42, %v142_v14  ;;  %v320_v53 = vmul.f32 1.442695, %v319_v13  ;;  %v133_v43 = vmul.f32 %v132_v59, %v1430_v2  ;;  %v391_v63 = vand.u32 2147483647, %v1561_v23 }
  0x68   :  { %v213_v8 = vadd.f32 %v212_v48, %v175_v54  ;;  %v215_v55 = vsub.f32 %v1152_v41, %v214_v50  ;;  %v1154_v38 = vpop.eup %1153  ;;  %v490_v15 = vstv %s1565_s5  ;;  %v492_v1 = vstv %s1570_s6  ;;  %s1750_s5 = sld [smem:[#allocation2 + $0x29]] }
  0x69   :  { %1163 = vpow2.f32 %v320_v53  ;;  %v349_v30 = vmul.f32 0.6931472, %v1154_v38  ;;  %v458_v6 = vmul.f32 1.442695, %v457_v62  ;;  %v491_v7 = vmul.f32 %v490_v15, %v1299_v0  ;;  %s1760_s6 = sld [smem:[#allocation2 + $0x12]] }
  0x6a   :  { %v217_v58 = vmul.f32 %v216_v16, %v215_v55  ;;  %v389_v9 = vadd.f32 1.0, %v388_v56  ;;  %v325_v12 = vstv %s1577_s8  ;;  %v528_v61 = vstv %s1590_s9  ;;  %s1767_s8 = sld [smem:[#allocation2 + $0x6b]] }
  0x6b   :  { %v355_v16 = vsel %vm1598_vm8, %v352_v11, %v349_v30  ;;  %1165 = vpow2.f32 %v458_v6  ;;  %v1629_v36 = vadd.f32 %v492_v1, %v491_v7  ;;  %v530_v14 = vstv %s1593_s10  ;;  %s1775_s9 = sld [smem:[#allocation2 + $0x2a]] }
  0x6c   :  { %v1156_v3 = vpop.eup %1155  ;;  %v218_v5 = vadd.f32 %v217_v58, %v180_v44  ;;  %v1624_v52 = vadd.f32 %v355_v16, %v346_v4  ;;  %v134_v32 = vadd.f32 %v133_v43, %v96_v60  ;;  %v384_v19 = vmax.f32 %v1459_v17, 0.0  ;;  %s1779_s10 = sld [smem:[#allocation2 + $0x3c]] }
  0x6d   :  { %v250_v59 = vmul.f32 %v1156_v3, %v249_v25  ;;  %v252_v2 = vmul.f32 %v1156_v3, %v1156_v3  ;;  %v494_v33 = vand.u32 2147483647, %v1629_v36  ;;  %v529_v54 = vmul.f32 %v528_v61, %v1299_v0 }
  0x6e   :  { %v357_v25 = vsub.f32 %v1391_v39, %v1624_v52  ;;  %v390_v41 = vmul.f32 %v1561_v23, %v389_v9  ;;  %vm1647_vm9 = vcmp.lt.f32.partialorder %v391_v63, 0.0004427343  ;;  %v208_v55 = vstv %s1603_s7  ;;  %s1786_s7 = sld [smem:[#allocation2 + $0x54]] }
  0x6f   :  { %v251_v18 = vadd.f32 %v250_v59, %v213_v8  ;;  %v253_v20 = vsub.f32 %v1156_v3, %v252_v2  ;;  %v495_v46 = vsub.f32 0.0, %v494_v33  ;;  %v1653_v47 = vadd.f32 %v530_v14, %v529_v54 }
  0x70   :  { %v1158_v34 = vpop.eup %1157  ;;  %v358_v40 = vmul.f32 1.442695, %v357_v25  ;;  %v246_v11 = vstv %s1610_s11  ;;  %v330_v58 = vstv %s1626_s14  ;;  %v209_v62 = vmul.f32 %v208_v55, %v1485_v24  ;;  %s1804_s14 = sld [smem:[#allocation2 + $0x3d]] }
  0x71   :  { %v255_v57 = vmul.f32 %v254_v31, %v253_v20  ;;  %v1160_v42 = vpop.eup %1159  ;;  %v288_v13 = vmul.f32 %v1158_v34, %v287_v21  ;;  %v290_v45 = vmul.f32 %v1158_v34, %v1158_v34  ;;  %v171_v31 = vmul.f32 %v170_v27, %v1461_v28  ;;  %s2101_s11 = sld [smem:[#allocation2 + $0x5a]] }
  0x72   :  { %1167 = vpow2.f32 %v358_v40  ;;  %v387_v23 = vmul.f32 0.6931472, %v1160_v42  ;;  %v1662_v50 = vpop.eup %1161  ;;  %v496_v53 = vmul.f32 1.442695, %v495_v46  ;;  %v532_v8 = vand.u32 2147483647, %v1653_v47 }
  0x73   :  { %v256_v48 = vadd.f32 %v255_v57, %v218_v5  ;;  %v289_v21 = vadd.f32 %v288_v13, %v251_v18  ;;  %v291_v44 = vsub.f32 %v1158_v34, %v290_v45  ;;  %v423_v28 = vadd.f32 1.0, %v1662_v50 }
  0x74   :  { %v393_v27 = vsel %vm1647_vm9, %v390_v41, %v387_v23  ;;  %1169 = vpow2.f32 %v496_v53  ;;  %v533_v49 = vsub.f32 0.0, %v532_v8  ;;  %v172_v30 = vadd.f32 %v171_v31, %v134_v32 }
  0x75   :  { %v293_v38 = vmul.f32 %v292_v51, %v291_v44  ;;  %v1676_v4 = vadd.f32 %v393_v27, %v384_v19  ;;  %1171 = vlog2.f32 %v423_v28  ;;  %v284_v63 = vstv %s1615_s12  ;;  %s2105_s12 = sld [smem:[#allocation2 + $0x43]] }
  0x76   :  { %v1164_v22 = vpop.eup %1163  ;;  %v534_v3 = vmul.f32 1.442695, %v533_v49  ;;  %v322_v5 = vstv %s1622_s13  ;;  %v426_v6 = vmul.f32 -0.5, %v1662_v50  ;;  %v566_v7 = vstv %s1655_s18  ;;  %s1800_s13 = sld [smem:[#allocation2 + $0x6c]] }
  0x77   :  { %v326_v56 = vmul.f32 %v1164_v22, %v325_v12  ;;  %v328_v60 = vmul.f32 %v1164_v22, %v1164_v22  ;;  %v294_v43 = vadd.f32 %v293_v38, %v256_v48  ;;  %v395_v51 = vsub.f32 %v1459_v17, %v1676_v4  ;;  %s1843_s18 = sld [smem:[#allocation2 + $0x2b]] }
  0x78   :  { %v1692_v24 = vpop.eup %1165  ;;  %1173 = vpow2.f32 %v534_v3  ;;  %v567_v17 = vmul.f32 %v566_v7, %v1299_v0  ;;  %v568_v2 = vstv %s1660_s19  ;;  %v210_v9 = vadd.f32 %v209_v62, %v172_v30  ;;  %s1868_s19 = sld [smem:[#allocation2 + $0x14]] }
  0x79   :  { %v327_v15 = vadd.f32 %v326_v56, %v289_v21  ;;  %v329_v1 = vsub.f32 %v1164_v22, %v328_v60  ;;  %v396_v16 = vmul.f32 1.442695, %v395_v51  ;;  %v247_v12 = vmul.f32 %v246_v11, %v1518_v35 }
  0x7a   :  { %v461_v61 = vadd.f32 1.0, %v1692_v24  ;;  %v360_v20 = vstv %s1632_s15  ;;  %v363_v25 = vstv %s1637_s16  ;;  %v1704_v14 = vadd.f32 %v568_v2, %v567_v17  ;;  %s1824_s16 = sld [smem:[#allocation2 + $0x13]] }
  0x7b   :  { %v331_v59 = vmul.f32 %v330_v58, %v329_v1  ;;  %1175 = vpow2.f32 %v396_v16  ;;  %v368_v32 = vstv %s1644_s17  ;;  %v398_v19 = vstv %s1664_s0  ;;  %s1835_s17 = sld [smem:[#allocation2 + $0x6d]] }
  0x7c   :  { %v427_v33 = vadd.f32 1.0, %v426_v6  ;;  %1177 = vlog2.f32 %v461_v61  ;;  %v401_v35 = vstv %s1669_s20  ;;  %v570_v54 = vand.u32 2147483647, %v1704_v14  ;;  %s1851_s15 = sld [smem:[#allocation2 + $0x3e]] }
  0x7d   :  { %v332_v18 = vadd.f32 %v331_v59, %v294_v43  ;;  %v604_v34 = vstv %s1678_s21  ;;  %v606_v57 = vstv %s1681_s22  ;;  %v248_v41 = vadd.f32 %v247_v12, %v210_v9  ;;  %s1876_s0 = sld [smem:[#allocation2 + $0x56]] }
  0x7e   :  { %v422_v39 = vmax.f32 %v1507_v26, 0.0  ;;  %v429_v42 = vand.u32 2147483647, %v1662_v50  ;;  %v605_v13 = vmul.f32 %v604_v34, %v1299_v0  ;;  %v285_v45 = vmul.f32 %v284_v63, %v1542_v10  ;;  %s1880_s20 = sld [smem:[#allocation2 + $0x2c]] }
  0x7f   :  { %v1168_v40 = vpop.eup %1167  ;;  %v571_v48 = vsub.f32 0.0, %v570_v54  ;;  %v428_v23 = vmul.f32 %v1662_v50, %v427_v33  ;;  %v464_v21 = vmul.f32 -0.5, %v1692_v24  ;;  %v642_v53 = vstv %s1690_s23  ;;  %s1917_s21 = sld [smem:[#allocation2 + $0x15]] }
  0x80   :  { %v364_v46 = vmul.f32 %v1168_v40, %v363_v25  ;;  %v366_v31 = vmul.f32 %v1168_v40, %v1168_v40  ;;  %v1724_v44 = vadd.f32 %v606_v57, %v605_v13  ;;  %v643_v27 = vmul.f32 %v642_v53, %v1299_v0  ;;  %s1928_s22 = sld [smem:[#allocation2 + $0x6e]] }
  0x81   :  { %v1727_v8 = vpop.eup %1169  ;;  %v572_v10 = vmul.f32 1.442695, %v571_v48  ;;  %vm1732_vm10 = vcmp.lt.f32.partialorder %v429_v42, 0.0004427343  ;;  %v644_v49 = vstv %s1698_s24  ;;  %v406_v60 = vstv %s1702_s25  ;;  %s1934_s23 = sld [smem:[#allocation2 + $0x2d]] }
  0x82   :  { %v365_v55 = vadd.f32 %v364_v46, %v327_v15  ;;  %v367_v11 = vsub.f32 %v1168_v40, %v366_v31  ;;  %v1172_v28 = vpop.eup %1171  ;;  %v499_v50 = vadd.f32 1.0, %v1727_v8  ;;  %v608_v38 = vand.u32 2147483647, %v1724_v44  ;;  %v1791_v46 = vld [vmem:[%s2184_s1] sm:$0xff]  ;;  %s1818_s1 = sld [smem:[#allocation2 + $0x55]] }
  0x83   :  { %v425_v58 = vmul.f32 0.6931472, %v1172_v28  ;;  %1179 = vpow2.f32 %v572_v10  ;;  %v436_v30 = vstv %s1708_s26  ;;  %v467_v0 = vand.u32 2147483647, %v1692_v24  ;;  %s1938_s24 = sld [smem:[#allocation2 + $0x3f]] }
  0x84   :  { %v369_v56 = vmul.f32 %v368_v32, %v367_v11  ;;  %1181 = vlog2.f32 %v499_v50  ;;  %v609_v62 = vsub.f32 0.0, %v608_v38  ;;  %v465_v63 = vadd.f32 1.0, %v464_v21  ;;  %s1950_s25 = sld [smem:[#allocation2 + $0x57]] }
  0x85   :  { %v431_v51 = vsel %vm1732_vm10, %v428_v23, %v425_v58  ;;  %v1748_v15 = vadd.f32 %v644_v49, %v643_v27  ;;  %v1752_v1 = vpop.eup %1173  ;;  %v286_v3 = vadd.f32 %v285_v45, %v248_v41  ;;  %v323_v16 = vmul.f32 %v322_v5, %v1567_v29  ;;  %s1969_s26 = sld [smem:[#allocation2 + $0x58]] }
  0x86   :  { %v370_v43 = vadd.f32 %v369_v56, %v332_v18  ;;  %v1757_v6 = vadd.f32 %v431_v51, %v422_v39  ;;  %v439_v7 = vstv %s1714_s27  ;;  %v502_v17 = vmul.f32 -0.5, %v1727_v8  ;;  %s1959_s27 = sld [smem:[#allocation2 + $0x6f]] }
  0x87   :  { %v537_v2 = vadd.f32 1.0, %v1752_v1  ;;  %v610_v9 = vmul.f32 1.442695, %v609_v62  ;;  %v646_v12 = vand.u32 2147483647, %v1748_v15  ;;  %v460_v29 = vmax.f32 %v1573_v37, 0.0 }
  0x88   :  { %v1176_v59 = vpop.eup %1175  ;;  %v433_v25 = vsub.f32 %v1507_v26, %v1757_v6  ;;  %v466_v32 = vmul.f32 %v1692_v24, %v465_v63  ;;  %vm1771_vm11 = vcmp.lt.f32.partialorder %v467_v0, 0.0004427343  ;;  %v505_v57 = vand.u32 2147483647, %v1727_v8 }
  0x89   :  { %v402_v61 = vmul.f32 %v1176_v59, %v401_v35  ;;  %v404_v18 = vmul.f32 %v1176_v59, %v1176_v59  ;;  %v1178_v5 = vpop.eup %1177  ;;  %1183 = vlog2.f32 %v537_v2  ;;  %v647_v54 = vsub.f32 0.0, %v646_v12 }
  0x8a   :  { %v434_v26 = vmul.f32 1.442695, %v433_v25  ;;  %v463_v40 = vmul.f32 0.6931472, %v1178_v5  ;;  %v503_v24 = vadd.f32 1.0, %v502_v17  ;;  %1185 = vpow2.f32 %v610_v9 }
  0x8b   :  { %v1777_v35 = vadd.f32 %v402_v61, %v365_v55  ;;  %v405_v34 = vsub.f32 %v1176_v59, %v404_v18  ;;  %v648_v41 = vmul.f32 1.442695, %v647_v54  ;;  %v540_v42 = vmul.f32 -0.5, %v1752_v1 }
  0x8c   :  { %1187 = vpow2.f32 %v434_v26  ;;  %v680_v13 = vstv %s1744_s4  ;;  %v469_v45 = vsel %vm1771_vm11, %v466_v32, %v463_v40  ;;  %v682_v48 = vstv %s1750_s5  ;;  %s1995_s4 = sld [smem:[#allocation2 + $0x70]] }
  0x8d   :  { %v407_v39 = vmul.f32 %v406_v60, %v405_v34  ;;  %1189 = vpow2.f32 %v648_v41  ;;  %v681_v31 = vmul.f32 %v1791_v46, %v680_v13  ;;  %v324_v23 = vadd.f32 %v323_v16, %v286_v3  ;;  %s2024_s5 = sld [smem:[#allocation2 + $0x2f]] }
  0x8e   :  { %v444_v53 = vstv %s1720_s28  ;;  %v1798_v55 = vadd.f32 %v469_v45, %v460_v29  ;;  %v474_v11 = vstv %s1729_s29  ;;  %v498_v10 = vmax.f32 %v1629_v36, 0.0  ;;  %s1977_s28 = sld [smem:[#allocation2 + $0x16]] }
  0x8f   :  { %v1795_v21 = vadd.f32 %v407_v39, %v370_v43  ;;  %v1806_v27 = vadd.f32 %v682_v48, %v681_v31  ;;  %v718_v28 = vstv %s1760_s6  ;;  %v504_v38 = vmul.f32 %v1727_v8, %v503_v24  ;;  %s2018_s29 = sld [smem:[#allocation2 + $0x17]] }
  0x90   :  { %v1809_v22 = vpop.eup %1179  ;;  %v471_v50 = vsub.f32 %v1573_v37, %v1798_v55  ;;  %vm1814_vm12 = vcmp.lt.f32.partialorder %v505_v57, 0.0004427343  ;;  %v719_v56 = vmul.f32 %v1791_v46, %v718_v28  ;;  %v541_v58 = vadd.f32 1.0, %v540_v42  ;;  %s2043_s6 = sld [smem:[#allocation2 + $0x40]] }
  0x91   :  { %v1182_v60 = vpop.eup %1181  ;;  %v575_v0 = vadd.f32 1.0, %v1809_v22  ;;  %v684_v62 = vand.u32 2147483647, %v1806_v27  ;;  %v720_v43 = vstv %s1775_s9  ;;  %v477_v8 = vstv %s1740_s30  ;;  %s1992_s30 = sld [smem:[#allocation2 + $0x2e]] }
  0x92   :  { %v472_v37 = vmul.f32 1.442695, %v471_v50  ;;  %v501_v51 = vmul.f32 0.6931472, %v1182_v60  ;;  %v543_v63 = vand.u32 2147483647, %v1752_v1  ;;  %v482_v3 = vstv %s1767_s8 }
  0x93   :  { %v512_v16 = vstv %s1779_s10  ;;  %1191 = vlog2.f32 %v575_v0  ;;  %v685_v59 = vsub.f32 0.0, %v684_v62  ;;  %v361_v17 = vmul.f32 %v360_v20, %v1624_v52  ;;  %s2055_s8 = sld [smem:[#allocation2 + $0x59]] }
  0x94   :  { %1193 = vpow2.f32 %v472_v37  ;;  %v507_v2 = vsel %vm1814_vm12, %v504_v38, %v501_v51  ;;  %v1837_v9 = vadd.f32 %v720_v43, %v719_v56  ;;  %v515_v61 = vstv %s1786_s7  ;;  %s2073_s9 = sld [smem:[#allocation2 + $0x71]] }
  0x95   :  { %v1839_v12 = vadd.f32 %v507_v2, %v498_v10  ;;  %v542_v18 = vmul.f32 %v1752_v1, %v541_v58  ;;  %v686_v25 = vmul.f32 1.442695, %v685_v59  ;;  %v520_v20 = vstv %s1800_s13  ;;  %s2081_s10 = sld [smem:[#allocation2 + $0x41]] }
  0x96   :  { %v1184_v52 = vpop.eup %1183  ;;  %v536_v29 = vmax.f32 %v1653_v47, 0.0  ;;  %vm1847_vm13 = vcmp.lt.f32.partialorder %v543_v63, 0.0004427343  ;;  %v578_v32 = vmul.f32 -0.5, %v1809_v22  ;;  %v722_v54 = vand.u32 2147483647, %v1837_v9 }
  0x97   :  { %v509_v1 = vsub.f32 %v1629_v36, %v1839_v12  ;;  %v539_v33 = vmul.f32 0.6931472, %v1184_v52  ;;  %1195 = vpow2.f32 %v686_v25  ;;  %v1857_v34 = vpop.eup %1185  ;;  %v362_v26 = vadd.f32 %v361_v17, %v324_v23  ;;  %s2094_s7 = sld [smem:[#allocation2 + $0x42]] }
  0x98   :  { %v399_v57 = vmul.f32 %v398_v19, %v1676_v4  ;;  %v550_v40 = vstv %s1804_s14  ;;  %v553_v24 = vstv %s1818_s1  ;;  %v613_v36 = vadd.f32 1.0, %v1857_v34  ;;  %s2112_s13 = sld [smem:[#allocation2 + $0x72]] }
  0x99   :  { %v1188_v41 = vpop.eup %1187  ;;  %v510_v39 = vmul.f32 1.442695, %v509_v1  ;;  %v545_v42 = vsel %vm1847_vm13, %v542_v18, %v539_v33  ;;  %v756_v13 = vstv %s1824_s16  ;;  %v581_v19 = vand.u32 2147483647, %v1809_v22  ;;  %s2114_s14 = sld [smem:[#allocation2 + $0x44]] }
  0x9a   :  { %v1870_v45 = vpop.eup %1189  ;;  %v440_v31 = vmul.f32 %v1188_v41, %v439_v7  ;;  %v442_v48 = vmul.f32 %v1188_v41, %v1188_v41  ;;  %v1874_v4 = vadd.f32 %v545_v42, %v536_v29  ;;  %v579_v23 = vadd.f32 1.0, %v578_v32  ;;  %s2123_s1 = sld [smem:[#allocation2 + $0x5b]] }
  0x9b   :  { %1197 = vpow2.f32 %v510_v39  ;;  %v651_v10 = vadd.f32 1.0, %v1870_v45  ;;  %v723_v28 = vsub.f32 0.0, %v722_v54  ;;  %v757_v49 = vmul.f32 %v1791_v46, %v756_v13  ;;  %s2128_s16 = sld [smem:[#allocation2 + $0x73]] }
  0x9c   :  { %v441_v50 = vadd.f32 %v440_v31, %v1777_v35  ;;  %v443_v7 = vsub.f32 %v1188_v41, %v442_v48  ;;  %v547_v38 = vsub.f32 %v1653_v47, %v1874_v4  ;;  %v1886_v56 = vadd.f32 %v399_v57, %v362_v26 }
  0x9d   :  { %v558_v60 = vstv %s1835_s17  ;;  %1199 = vlog2.f32 %v613_v36  ;;  %v758_v58 = vstv %s1843_s18  ;;  %v588_v43 = vstv %s1851_s15  ;;  %s2132_s17 = sld [smem:[#allocation2 + $0x5c]] }
  0x9e   :  { %v445_v0 = vmul.f32 %v444_v53, %v443_v7  ;;  %v548_v62 = vmul.f32 1.442695, %v547_v38  ;;  %1201 = vlog2.f32 %v651_v10  ;;  %v574_v35 = vmax.f32 %v1704_v14, 0.0  ;;  %s2136_s18 = sld [smem:[#allocation2 + $0x74]] }
  0x9f   :  { %v580_v37 = vmul.f32 %v1809_v22, %v579_v23  ;;  %v616_v47 = vmul.f32 -0.5, %v1857_v34  ;;  %v724_v51 = vmul.f32 1.442695, %v723_v28  ;;  %vm1897_vm14 = vcmp.lt.f32.partialorder %v581_v19, 0.0004427343  ;;  %s2139_s15 = sld [smem:[#allocation2 + $0x45]] }
  0xa0   :  { %v1192_v63 = vpop.eup %1191  ;;  %v446_v59 = vadd.f32 %v445_v0, %v1795_v21  ;;  %1203 = vpow2.f32 %v548_v62  ;;  %v1901_v17 = vadd.f32 %v758_v58, %v757_v49  ;;  %v654_v25 = vmul.f32 -0.5, %v1870_v45 }
  0xa1   :  { %v1194_v2 = vpop.eup %1193  ;;  %v577_v18 = vmul.f32 0.6931472, %v1192_v63  ;;  %1205 = vpow2.f32 %v724_v51  ;;  %v794_v22 = vstv %s1868_s19  ;;  %v591_v5 = vstv %s1876_s0  ;;  %s2147_s19 = sld [smem:[#allocation2 + $0x46]] }
  0xa2   :  { %v478_v52 = vmul.f32 %v1194_v2, %v477_v8  ;;  %v480_v29 = vmul.f32 %v1194_v2, %v1194_v2  ;;  %v760_v21 = vand.u32 2147483647, %v1901_v17  ;;  %v617_v1 = vadd.f32 1.0, %v616_v47  ;;  %s2156_s0 = sld [smem:[#allocation2 + $0x78]] }
  0xa3   :  { %v583_v32 = vsel %vm1897_vm14, %v580_v37, %v577_v18  ;;  %v795_v33 = vmul.f32 %v1791_v46, %v794_v22  ;;  %v796_v54 = vstv %s1880_s20  ;;  %v619_v8 = vand.u32 2147483647, %v1857_v34  ;;  %s2163_s20 = sld [smem:[#allocation2 + $0x47]] }
  0xa4   :  { %v1913_v26 = vpop.eup %1195  ;;  %v479_v57 = vadd.f32 %v478_v52, %v441_v50  ;;  %v481_v41 = vsub.f32 %v1194_v2, %v480_v29  ;;  %v1915_v39 = vadd.f32 %v583_v32, %v574_v35  ;;  %v761_v42 = vsub.f32 0.0, %v760_v21 }
  0xa5   :  { %v655_v36 = vadd.f32 1.0, %v654_v25  ;;  %v689_v13 = vadd.f32 1.0, %v1913_v26  ;;  %v1921_v31 = vadd.f32 %v796_v54, %v795_v33  ;;  %v657_v23 = vand.u32 2147483647, %v1870_v45 }
  0xa6   :  { %v483_v48 = vmul.f32 %v482_v3, %v481_v41  ;;  %v585_v19 = vsub.f32 %v1704_v14, %v1915_v39  ;;  %v762_v10 = vmul.f32 1.442695, %v761_v42  ;;  %v612_v28 = vmax.f32 %v1724_v44, 0.0 }
  0xa7   :  { %v650_v50 = vmax.f32 %v1748_v15, 0.0  ;;  %1207 = vlog2.f32 %v689_v13  ;;  %v798_v7 = vand.u32 2147483647, %v1921_v31  ;;  %v618_v3 = vmul.f32 %v1857_v34, %v617_v1 }
  0xa8   :  { %v1198_v38 = vpop.eup %1197  ;;  %v484_v49 = vadd.f32 %v483_v48, %v446_v59  ;;  %v586_v58 = vmul.f32 1.442695, %v585_v19  ;;  %1209 = vpow2.f32 %v762_v10  ;;  %v692_v62 = vmul.f32 -0.5, %v1913_v26 }
  0xa9   :  { %v516_v14 = vmul.f32 %v1198_v38, %v515_v61  ;;  %v518_v0 = vmul.f32 %v1198_v38, %v1198_v38  ;;  %v799_v35 = vsub.f32 0.0, %v798_v7  ;;  %vm1941_vm15 = vcmp.lt.f32.partialorder %v619_v8, 0.0004427343 }
  0xaa   :  { %v1200_v37 = vpop.eup %1199  ;;  %1211 = vpow2.f32 %v586_v58  ;;  %v656_v34 = vmul.f32 %v1870_v45, %v655_v36  ;;  %vm1946_vm0 = vcmp.lt.f32.partialorder %v657_v23, 0.0004427343  ;;  %v437_v18 = vmul.f32 %v436_v30, %v1757_v6 }
  0xab   :  { %v1202_v61 = vpop.eup %1201  ;;  %v517_v63 = vadd.f32 %v516_v14, %v479_v57  ;;  %v519_v59 = vsub.f32 %v1198_v38, %v518_v0  ;;  %v615_v53 = vmul.f32 0.6931472, %v1200_v37  ;;  %v800_v2 = vmul.f32 1.442695, %v799_v35 }
  0xac   :  { %v653_v25 = vmul.f32 0.6931472, %v1202_v61  ;;  %v695_v22 = vand.u32 2147483647, %v1913_v26  ;;  %v832_v52 = vstv %s1917_s21  ;;  %v693_v32 = vadd.f32 1.0, %v692_v62  ;;  %s1094_s21 = sld [smem:[#allocation2 + $0x5d]] }
  0xad   :  { %v1204_v45 = vpop.eup %1203  ;;  %v521_v29 = vmul.f32 %v520_v20, %v519_v59  ;;  %v621_v21 = vsel %vm1941_vm15, %v618_v3, %v615_v53  ;;  %1213 = vpow2.f32 %v800_v2  ;;  %v833_v42 = vmul.f32 %v1791_v46, %v832_v52 }
  0xae   :  { %v1963_v1 = vpop.eup %1205  ;;  %v554_v30 = vmul.f32 %v1204_v45, %v553_v24  ;;  %v556_v6 = vmul.f32 %v1204_v45, %v1204_v45  ;;  %v1967_v33 = vadd.f32 %v621_v21, %v612_v28  ;;  %v659_v20 = vsel %vm1946_vm0, %v656_v34, %v653_v25 }
  0xaf   :  { %v522_v54 = vadd.f32 %v521_v29, %v484_v49  ;;  %v1973_v57 = vadd.f32 %v659_v20, %v650_v50  ;;  %v727_v41 = vadd.f32 1.0, %v1963_v1  ;;  %v834_v13 = vstv %s1934_s23  ;;  %s1095_s23 = sld [smem:[#allocation2 + $0x75]] }
  0xb0   :  { %v555_v24 = vadd.f32 %v554_v30, %v517_v63  ;;  %v557_v8 = vsub.f32 %v1204_v45, %v556_v6  ;;  %v623_v36 = vsub.f32 %v1724_v44, %v1967_v33  ;;  %v596_v48 = vstv %s1928_s22  ;;  %s986_s22 = sld [smem:[#allocation2 + $0x79]] }
  0xb1   :  { %v626_v19 = vstv %s1938_s24  ;;  %v661_v23 = vsub.f32 %v1748_v15, %v1973_v57  ;;  %1215 = vlog2.f32 %v727_v41  ;;  %v438_v10 = vadd.f32 %v437_v18, %v1886_v56  ;;  %s1099_s24 = sld [smem:[#allocation2 + $0x5e]] }
  0xb2   :  { %v475_v28 = vmul.f32 %v474_v11, %v1798_v55  ;;  %v559_v50 = vmul.f32 %v558_v60, %v557_v8  ;;  %v624_v7 = vmul.f32 1.442695, %v623_v36  ;;  %v629_v38 = vstv %s1950_s25  ;;  %s1100_s25 = sld [smem:[#allocation2 + $0x76]] }
  0xb3   :  { %v662_v44 = vmul.f32 1.442695, %v661_v23  ;;  %v694_v49 = vmul.f32 %v1913_v26, %v693_v32  ;;  %v1998_v15 = vadd.f32 %v834_v13, %v833_v42  ;;  %v688_v55 = vmax.f32 %v1806_v27, 0.0 }
  0xb4   :  { %v1208_v56 = vpop.eup %1207  ;;  %v560_v58 = vadd.f32 %v559_v50, %v522_v54  ;;  %1217 = vpow2.f32 %v624_v7  ;;  %vm2001_vm1 = vcmp.lt.f32.partialorder %v695_v22, 0.0004427343  ;;  %v730_v26 = vmul.f32 -0.5, %v1963_v1 }
  0xb5   :  { %v2005_v60 = vpop.eup %1209  ;;  %1219 = vpow2.f32 %v662_v44  ;;  %v691_v3 = vmul.f32 0.6931472, %v1208_v56  ;;  %v836_v14 = vand.u32 2147483647, %v1998_v15  ;;  %v476_v0 = vadd.f32 %v475_v28, %v438_v10 }
  0xb6   :  { %v634_v62 = vstv %s1959_s27  ;;  %v667_v35 = vstv %s1969_s26  ;;  %v765_v37 = vadd.f32 1.0, %v2005_v60  ;;  %v513_v34 = vmul.f32 %v512_v16, %v1839_v12  ;;  %s1104_s27 = sld [smem:[#allocation2 + $0x5f]] }
  0xb7   :  { %v1212_v47 = vpop.eup %1211  ;;  %v697_v51 = vsel %vm2001_vm1, %v694_v49, %v691_v3  ;;  %v837_v61 = vsub.f32 0.0, %v836_v14  ;;  %v870_v63 = vstv %s1977_s28  ;;  %v731_v18 = vadd.f32 1.0, %v730_v26  ;;  %s1105_s26 = sld [smem:[#allocation2 + $0x77]] }
  0xb8   :  { %v592_v59 = vmul.f32 %v1212_v47, %v591_v5  ;;  %v594_v53 = vmul.f32 %v1212_v47, %v1212_v47  ;;  %v2022_v2 = vadd.f32 %v697_v51, %v688_v55  ;;  %1221 = vlog2.f32 %v765_v37 }
  0xb9   :  { %v733_v16 = vand.u32 2147483647, %v1963_v1  ;;  %v838_v12 = vmul.f32 1.442695, %v837_v61  ;;  %v871_v25 = vmul.f32 %v1791_v46, %v870_v63  ;;  %v872_v29 = vstv %s1992_s30 }
  0xba   :  { %v2028_v22 = vpop.eup %1213  ;;  %v593_v52 = vadd.f32 %v592_v59, %v555_v24  ;;  %v595_v45 = vsub.f32 %v1212_v47, %v594_v53  ;;  %v699_v5 = vsub.f32 %v1806_v27, %v2022_v2  ;;  %v514_v21 = vadd.f32 %v513_v34, %v476_v0 }
  0xbb   :  { %v551_v32 = vmul.f32 %v550_v40, %v1874_v4  ;;  %v672_v30 = vstv %s1995_s4  ;;  %v803_v6 = vadd.f32 1.0, %v2028_v22  ;;  %v768_v41 = vmul.f32 -0.5, %v2005_v60 }
  0xbc   :  { %v597_v20 = vmul.f32 %v596_v48, %v595_v45  ;;  %v700_v54 = vmul.f32 1.442695, %v699_v5  ;;  %1223 = vpow2.f32 %v838_v12  ;;  %v726_v42 = vmax.f32 %v1837_v9, 0.0 }
  0xbd   :  { %v732_v24 = vmul.f32 %v1963_v1, %v731_v18  ;;  %1225 = vlog2.f32 %v803_v6  ;;  %v2041_v27 = vadd.f32 %v872_v29, %v871_v25  ;;  %vm2045_vm2 = vcmp.lt.f32.partialorder %v733_v16, 0.0004427343 }
  0xbe   :  { %v1216_v8 = vpop.eup %1215  ;;  %v598_v40 = vadd.f32 %v597_v20, %v560_v58  ;;  %1227 = vpow2.f32 %v700_v54  ;;  %v771_v36 = vand.u32 2147483647, %v2005_v60  ;;  %v552_v13 = vadd.f32 %v551_v32, %v514_v21 }
  0xbf   :  { %v729_v48 = vmul.f32 0.6931472, %v1216_v8  ;;  %v764_v1 = vmax.f32 %v1901_v17, 0.0  ;;  %v874_v23 = vand.u32 2147483647, %v2041_v27  ;;  %v589_v10 = vmul.f32 %v588_v43, %v1915_v39 }
  0xc0   :  { %v769_v28 = vadd.f32 1.0, %v768_v41  ;;  %v908_v50 = vstv %s2018_s29  ;;  %v910_v7 = vstv %s2024_s5  ;;  %v806_v56 = vmul.f32 -0.5, %v2028_v22 }
  0xc1   :  { %v1218_v44 = vpop.eup %1217  ;;  %v735_v49 = vsel %vm2045_vm2, %v732_v24, %v729_v48  ;;  %v875_v58 = vsub.f32 0.0, %v874_v23  ;;  %v909_v55 = vmul.f32 %v1791_v46, %v908_v50  ;;  %vm2067_vm3 = vcmp.lt.f32.partialorder %v771_v36, 0.0004427343 }
  0xc2   :  { %v1220_v11 = vpop.eup %1219  ;;  %v630_v3 = vmul.f32 %v1218_v44, %v629_v38  ;;  %v632_v26 = vmul.f32 %v1218_v44, %v1218_v44  ;;  %v2065_v14 = vadd.f32 %v735_v49, %v726_v42  ;;  %v770_v61 = vmul.f32 %v2005_v60, %v769_v28 }
  0xc3   :  { %v668_v39 = vmul.f32 %v1220_v11, %v667_v35  ;;  %v670_v0 = vmul.f32 %v1220_v11, %v1220_v11  ;;  %v876_v37 = vmul.f32 1.442695, %v875_v58  ;;  %v2071_v47 = vadd.f32 %v910_v7, %v909_v55 }
  0xc4   :  { %v631_v34 = vadd.f32 %v630_v3, %v593_v52  ;;  %v633_v51 = vsub.f32 %v1218_v44, %v632_v26  ;;  %v737_v38 = vsub.f32 %v1837_v9, %v2065_v14  ;;  %v807_v53 = vadd.f32 1.0, %v806_v56 }
  0xc5   :  { %v1222_v63 = vpop.eup %1221  ;;  %v671_v59 = vsub.f32 %v1220_v11, %v670_v0  ;;  %1229 = vpow2.f32 %v876_v37  ;;  %v912_v35 = vand.u32 2147483647, %v2071_v47  ;;  %v809_v25 = vand.u32 2147483647, %v2028_v22 }
  0xc6   :  { %v635_v18 = vmul.f32 %v634_v62, %v633_v51  ;;  %v669_v16 = vadd.f32 %v668_v39, %v631_v34  ;;  %v738_v12 = vmul.f32 1.442695, %v737_v38  ;;  %v664_v52 = vstv %s2043_s6 }
  0xc7   :  { %v673_v9 = vmul.f32 %v672_v30, %v671_v59  ;;  %v767_v45 = vmul.f32 0.6931472, %v1222_v63  ;;  %v913_v60 = vsub.f32 0.0, %v912_v35  ;;  %v590_v5 = vadd.f32 %v589_v10, %v552_v13 }
  0xc8   :  { %v636_v29 = vadd.f32 %v635_v18, %v598_v40  ;;  %v705_v21 = vstv %s2055_s8  ;;  %1231 = vpow2.f32 %v738_v12  ;;  %v627_v6 = vmul.f32 %v626_v19, %v1967_v33 }
  0xc9   :  { %v2086_v32 = vpop.eup %1223  ;;  %v773_v62 = vsel %vm2067_vm3, %v770_v61, %v767_v45  ;;  %v808_v20 = vmul.f32 %v2028_v22, %v807_v53  ;;  %v914_v54 = vmul.f32 1.442695, %v913_v60  ;;  %vm2096_vm4 = vcmp.lt.f32.partialorder %v809_v25, 0.0004427343 }
  0xca   :  { %v1226_v41 = vpop.eup %1225  ;;  %v674_v30 = vadd.f32 %v673_v9, %v636_v29  ;;  %v774_v42 = vadd.f32 %v773_v62, %v764_v1  ;;  %v841_v8 = vadd.f32 1.0, %v2086_v32  ;;  %v802_v19 = vmax.f32 %v1921_v31, 0.0 }
  0xcb   :  { %v1228_v33 = vpop.eup %1227  ;;  %v805_v40 = vmul.f32 0.6931472, %v1226_v41  ;;  %1233 = vpow2.f32 %v914_v54  ;;  %v710_v36 = vstv %s2073_s9  ;;  %v628_v48 = vadd.f32 %v627_v6, %v590_v5 }
  0xcc   :  { %v706_v22 = vmul.f32 %v1228_v33, %v705_v21  ;;  %v708_v4 = vmul.f32 %v1228_v33, %v1228_v33  ;;  %v775_v13 = vsub.f32 %v1901_v17, %v774_v42  ;;  %v665_v1 = vmul.f32 %v664_v52, %v1973_v57 }
  0xcd   :  { %v811_v23 = vsel %vm2096_vm4, %v808_v20, %v805_v40  ;;  %1235 = vlog2.f32 %v841_v8  ;;  %v702_v10 = vstv %s2081_s10  ;;  %v844_v58 = vmul.f32 -0.5, %v2086_v32 }
  0xce   :  { %v707_v28 = vadd.f32 %v706_v22, %v669_v16  ;;  %v709_v50 = vsub.f32 %v1228_v33, %v708_v4  ;;  %v776_v7 = vmul.f32 1.442695, %v775_v13  ;;  %v812_v44 = vadd.f32 %v811_v23, %v802_v19 }
  0xcf   :  { %v666_v17 = vadd.f32 %v665_v1, %v628_v48  ;;  %v703_v57 = vmul.f32 %v702_v10, %v2022_v2  ;;  %v740_v3 = vstv %s2094_s7  ;;  %v743_v26 = vstv %s2101_s11 }
  0xd0   :  { %v711_v49 = vmul.f32 %v710_v36, %v709_v50  ;;  %1237 = vpow2.f32 %v776_v7  ;;  %v813_v56 = vsub.f32 %v1921_v31, %v812_v44  ;;  %v778_v0 = vstv %s2105_s12 }
  0xd1   :  { %v704_v34 = vadd.f32 %v703_v57, %v666_v17  ;;  %v741_v2 = vmul.f32 %v740_v3, %v2065_v14  ;;  %v845_v31 = vadd.f32 1.0, %v844_v58  ;;  %v847_v61 = vand.u32 2147483647, %v2086_v32 }
  0xd2   :  { %v2119_v55 = vpop.eup %1229  ;;  %v712_v11 = vadd.f32 %v711_v49, %v674_v30  ;;  %v814_v43 = vmul.f32 1.442695, %v813_v56  ;;  %v748_v63 = vstv %s2112_s13  ;;  %v816_v14 = vstv %s2114_s14 }
  0xd3   :  { %v879_v39 = vadd.f32 1.0, %v2119_v55  ;;  %v742_v18 = vadd.f32 %v741_v2, %v704_v34  ;;  %v779_v16 = vmul.f32 %v778_v0, %v774_v42  ;;  %v846_v12 = vmul.f32 %v2086_v32, %v845_v31 }
  0xd4   :  { %1239 = vpow2.f32 %v814_v43  ;;  %v840_v45 = vmax.f32 %v1998_v15, 0.0  ;;  %vm848_vm5 = vcmp.lt.f32.partialorder %v847_v61, 0.0004427343  ;;  %v882_v60 = vmul.f32 -0.5, %v2119_v55 }
  0xd5   :  { %v1232_v37 = vpop.eup %1231  ;;  %1241 = vlog2.f32 %v879_v39  ;;  %v781_v5 = vstv %s2123_s1  ;;  %v780_v62 = vadd.f32 %v779_v16, %v742_v18  ;;  %v817_v20 = vmul.f32 %v816_v14, %v812_v44 }
  0xd6   :  { %v744_v51 = vmul.f32 %v1232_v37, %v743_v26  ;;  %v746_v38 = vmul.f32 %v1232_v37, %v1232_v37  ;;  %v885_v54 = vand.u32 2147483647, %v2119_v55  ;;  %v883_v24 = vadd.f32 1.0, %v882_v60 }
  0xd7   :  { %v786_v8 = vstv %s2128_s16  ;;  %v819_v22 = vstv %s2132_s17  ;;  %v818_v36 = vadd.f32 %v817_v20, %v780_v62  ;;  %v824_v13 = vstv %s2136_s18 }
  0xd8   :  { %v2134_v59 = vpop.eup %1233  ;;  %v745_v53 = vadd.f32 %v744_v51, %v707_v28  ;;  %v747_v35 = vsub.f32 %v1232_v37, %v746_v38  ;;  %v854_v48 = vstv %s2139_s15  ;;  %v878_v1 = vmax.f32 %v2041_v27, 0.0 }
  0xd9   :  { %v917_v25 = vadd.f32 1.0, %v2134_v59  ;;  %v920_v33 = vmul.f32 -0.5, %v2134_v59  ;;  %v884_v50 = vmul.f32 %v2119_v55, %v883_v24  ;;  %vm2159_vm6 = vcmp.lt.f32.partialorder %v885_v54, 0.0004427343 }
  0xda   :  { %v1236_v52 = vpop.eup %1235  ;;  %v749_v9 = vmul.f32 %v748_v63, %v747_v35  ;;  %v923_v57 = vand.u32 2147483647, %v2134_v59  ;;  %v892_v43 = vstv %s2147_s19  ;;  %v916_v31 = vmax.f32 %v2071_v47, 0.0 }
  0xdb   :  { %v843_v29 = vmul.f32 0.6931472, %v1236_v52  ;;  %1243 = vlog2.f32 %v917_v25  ;;  %v921_v17 = vadd.f32 1.0, %v920_v33  ;;  %v930_v14 = vstv %s2163_s20 }
  0xdc   :  { %v750_v21 = vadd.f32 %v749_v9, %v712_v11  ;;  %vm924_vm7 = vcmp.lt.f32.partialorder %v923_v57, 0.0004427343  ;;  %v941_v18 = vstv %s2156_s0  ;;  %v857_v9 = vstv %s1094_s21 }
  0xdd   :  { %v1238_v6 = vpop.eup %1237  ;;  %v849_v32 = vsel %vm848_vm5, %v846_v12, %v843_v29  ;;  %v922_v37 = vmul.f32 %v2134_v59, %v921_v17  ;;  %v942_v52 = vmul.f32 %v1791_v46, %v941_v18  ;;  %v862_v62 = vstv %s1095_s23 }
  0xde   :  { %v782_v41 = vmul.f32 %v1238_v6, %v781_v5  ;;  %v784_v30 = vmul.f32 %v1238_v6, %v1238_v6  ;;  %v850_v42 = vadd.f32 %v849_v32, %v840_v45  ;;  %v944_v5 = vstv %s986_s22 }
  0xe0   :  { %v783_v19 = vadd.f32 %v782_v41, %v745_v53  ;;  %v785_v40 = vsub.f32 %v1238_v6, %v784_v30  ;;  %v851_v4 = vsub.f32 %v1998_v15, %v850_v42  ;;  %v855_v58 = vmul.f32 %v854_v48, %v850_v42 }
  0xe1   :  { %v1240_v23 = vpop.eup %1239  ;;  %v895_v42 = vstv %s1099_s24 }
  0xe2   :  { %v787_v10 = vmul.f32 %v786_v8, %v785_v40  ;;  %v852_v28 = vmul.f32 1.442695, %v851_v4  ;;  %v1242_v44 = vpop.eup %1241  ;;  %v820_v49 = vmul.f32 %v1240_v23, %v819_v22  ;;  %v822_v15 = vmul.f32 %v1240_v23, %v1240_v23 }
  0xe3   :  { %v881_v11 = vmul.f32 0.6931472, %v1242_v44  ;;  %v856_v2 = vadd.f32 %v855_v58, %v818_v36  ;;  %v900_v22 = vstv %s1100_s25 }
  0xe4   :  { %v788_v56 = vadd.f32 %v787_v10, %v750_v21  ;;  %1245 = vpow2.f32 %v852_v28  ;;  %v821_v3 = vadd.f32 %v820_v49, %v783_v19  ;;  %v823_v26 = vsub.f32 %v1240_v23, %v822_v15 }
  0xe5   :  { %v887_v55 = vsel %vm2159_vm6, %v884_v50, %v881_v11  ;;  %v938_v50 = vstv %s1105_s26 }
  0xe6   :  { %v825_v39 = vmul.f32 %v824_v13, %v823_v26  ;;  %v888_v0 = vadd.f32 %v887_v55, %v878_v1  ;;  %v933_v13 = vstv %s1104_s27 }
  0xe8   :  { %v1244_v34 = vpop.eup %1243  ;;  %v826_v51 = vadd.f32 %v825_v39, %v788_v56  ;;  %v889_v38 = vsub.f32 %v2041_v27, %v888_v0  ;;  %v893_v61 = vmul.f32 %v892_v43, %v888_v0 }
  0xe9   :  { %v919_v63 = vmul.f32 0.6931472, %v1244_v34 }
  0xea   :  { %v890_v53 = vmul.f32 1.442695, %v889_v38  ;;  %v894_v16 = vadd.f32 %v893_v61, %v856_v2 }
  0xeb   :  { %v925_v35 = vsel %vm924_vm7, %v922_v37, %v919_v63 }
  0xec   :  { %v926_v12 = vadd.f32 %v925_v35, %v916_v31  ;;  %1247 = vpow2.f32 %v890_v53 }
  0xee   :  { %v927_v59 = vsub.f32 %v2071_v47, %v926_v12  ;;  %v931_v25 = vmul.f32 %v930_v14, %v926_v12 }
  0xf0   :  { %v928_v45 = vmul.f32 1.442695, %v927_v59  ;;  %v932_v60 = vadd.f32 %v931_v25, %v894_v16 }
  0xf1   :  { %v1246_v27 = vpop.eup %1245 }
  0xf2   :  { %v858_v29 = vmul.f32 %v1246_v27, %v857_v9  ;;  %v860_v21 = vmul.f32 %v1246_v27, %v1246_v27  ;;  %1249 = vpow2.f32 %v928_v45  ;;  %v943_v6 = vadd.f32 %v942_v52, %v932_v60 }
  0xf4   :  { %v859_v20 = vadd.f32 %v858_v29, %v821_v3  ;;  %v861_v32 = vsub.f32 %v1246_v27, %v860_v21  ;;  %v945_v54 = vadd.f32 %v944_v5, %v943_v6 }
  0xf6   :  { %v863_v47 = vmul.f32 %v862_v62, %v861_v32  ;;  %v946_v41 = vand.u32 2147483647, %v945_v54  ;;  %v950_v43 = vmax.f32 %v945_v54, 0.0 }
  0xf8   :  { %v864_v30 = vadd.f32 %v863_v47, %v826_v51  ;;  %v947_v24 = vsub.f32 0.0, %v946_v41 }
  0xf9   :  { %v1248_v8 = vpop.eup %1247 }
  0xfa   :  { %v948_v33 = vmul.f32 1.442695, %v947_v24  ;;  %v896_v19 = vmul.f32 %v1248_v8, %v895_v42  ;;  %v898_v40 = vmul.f32 %v1248_v8, %v1248_v8 }
  0xfc   :  { %1251 = vpow2.f32 %v948_v33  ;;  %v897_v4 = vadd.f32 %v896_v19, %v859_v20  ;;  %v899_v36 = vsub.f32 %v1248_v8, %v898_v40 }
  0xfe   :  { %v901_v1 = vmul.f32 %v900_v22, %v899_v36 }
  0xff   :  { %v1250_v48 = vpop.eup %1249 }
 0x100   :  { %v934_v23 = vmul.f32 %v1250_v48, %v933_v13  ;;  %v936_v10 = vmul.f32 %v1250_v48, %v1250_v48  ;;  %v902_v28 = vadd.f32 %v901_v1, %v864_v30 }
 0x102   :  { %v935_v7 = vadd.f32 %v934_v23, %v897_v4  ;;  %v937_v44 = vsub.f32 %v1250_v48, %v936_v10 }
 0x104   :  { %v939_v49 = vmul.f32 %v938_v50, %v937_v44  ;;  %v964_v15 = vadd.f32 %v941_v18, %v935_v7 }
 0x106   :  { %v940_v17 = vadd.f32 %v939_v49, %v902_v28  ;;  %v968_v38 = vmul.f32 %v964_v15, %v964_v15 }
 0x109   :  { %v1252_v57 = vpop.eup %1251 }
 0x10a   :  { %v951_v56 = vadd.f32 1.0, %v1252_v57  ;;  %v954_v58 = vmul.f32 -0.5, %v1252_v57  ;;  %v957_v3 = vand.u32 2147483647, %v1252_v57 }
 0x10c   :  { %1253 = vlog2.f32 %v951_v56  ;;  %v955_v11 = vadd.f32 1.0, %v954_v58  ;;  %vm958_vm8 = vcmp.lt.f32.partialorder %v957_v3, 0.0004427343 }
 0x10e   :  { %v956_v26 = vmul.f32 %v1252_v57, %v955_v11 }
 0x119   :  { %v1254_v55 = vpop.eup %1253 }
 0x11a   :  { %v953_v39 = vmul.f32 0.6931472, %v1254_v55 }
 0x11c   :  { %v959_v0 = vsel %vm958_vm8, %v956_v26, %v953_v39 }
 0x11d   :  { %v960_v37 = vadd.f32 %v959_v0, %v950_v43 }
 0x11f   :  { %v961_v34 = vsub.f32 %v945_v54, %v960_v37 }
 0x121   :  { %v962_v2 = vmul.f32 1.442695, %v961_v34 }
 0x123   :  { %1255 = vpow2.f32 %v962_v2 }
 0x130   :  { %v1256_v31 = vpop.eup %1255 }
 0x131   :  { %v966_v51 = vmul.f32 %v1256_v31, %v1256_v31  ;;  %v970_v63 = vmul.f32 %v1256_v31, %v940_v17  ;;  %v965_v35 = vmul.f32 %v1256_v31, %v964_v15 }
 0x133   :  { %v967_v61 = vsub.f32 %v1256_v31, %v966_v51 }
 0x135   :  { %v969_v53 = vmul.f32 %v968_v38, %v967_v61 }
 0x137   :  { %v971_v14 = vadd.f32 %v970_v63, %v969_v53 }
 0x139   :  { %v972_v18 = vmul.f32 %v1791_v46, %v971_v14  ;;  %975 = vst [vmem:[%s2186_s3] sm:$0xff] %v971_v14 }
 0x13b   :  { %v973_v16 = vsub.f32 %v965_v35, %v972_v18 }
 0x13d   :  { %974 = vst [vmem:[%s2185_s2] sm:$0xff] %v973_v16 }
 0x13e   :  { %984 = vsyncpa [#allocation3], 1 }

</bundles_post_ra>
